<compile_context>
chip_gen: v7x
topology: tpu7x:2x2x1
jax: 0.10.0
libtpu: 0.0.40
codegen_flags: <defaults>
</compile_context>

<pallas_src>
import functools

import jax
import jax.numpy as jnp
from jax.experimental import pallas as pl
from jax.experimental.pallas import tpu as pltpu


def _vmem_limit_bytes():
    """Per-generation scoped-VMEM limit: ~96 MiB on 128-MiB chips (v5e/v6e),
    ~48 MiB on 64-MiB chips (v7x)."""
    cap = 128 * 1024 * 1024
    try:
        cap = int(getattr(pltpu.get_tpu_info(), "vmem_capacity_bytes", cap))
    except Exception:
        pass
    return min(96 * 1024 * 1024, (3 * cap) // 4)


def _pick_batch_block(batch):
    """Keep >=2 grid steps (both v7x TCs busy); block images for larger batches
    to amortize per-grid-step overhead and give the fc dot more rows."""
    if batch <= 2:
        return 1
    for cand in (8, 4, 2):
        if batch % cand == 0 and batch // cand >= 2:
            return cand
    return 1


# ---------------------------------------------------------------------------
# Fused kernel: conv3x3+ReLU -> conv3x3+ReLU -> global avg pool -> fc
# One batch block per grid step; everything stays in VMEM/vregs.
# ---------------------------------------------------------------------------
def _fused_trunk_pool_fc_kernel(xpe_ref, mask_ref, w1_ref, b1_ref, w2_ref,
                                b2_ref, wfc_ref, bfc_ref, out_ref,
                                *, offsets, halo, n_pad, ws, n_core, inv_hw,
                                bblk):
    """Shapes (per grid step), spatial-on-lanes layout:
      xpe_ref : (1, Bblk, Cinp, n_tot) bf16  channels on sublanes, flat padded
                                             image (+ lane halo) on lanes
      mask_ref: (1, n_pad)             f32   1.0 at real pixels, 0.0 at padding
      w1_ref  : (C1, 9*Cinp) bf16   b1_ref : (C1, 1)  f32
      w2_ref  : (C2, 9*C1)   f32    b2_ref : (C2, 1)  f32
      wfc_ref : (C2, 128)    f32    bfc_ref: (1, 128) f32
      out_ref : (1, Bblk, 128) f32
    """
    f32 = jnp.float32
    mask1 = mask_ref[...]                        # (1, n_pad)
    mask2 = mask1[:, ws:ws + n_core]             # (1, n_core)
    w1 = w1_ref[...]                             # bf16 - matches bf16 image
    w2 = w2_ref[...]                             # f32  - matches f32 features
    b1 = b1_ref[...]
    b2 = b2_ref[...]
    wfc = wfc_ref[...]
    bfc = bfc_ref[...]

    rows = []
    for i in range(bblk):
        # bf16 image goes straight into the MXU dot: no whole-image f32 upcast.
        x = xpe_ref[0, i]                        # (Cinp, n_tot) bf16

        # ---- conv1 (3x3, SAME): the 9 taps fused into one K=9*Cinp MXU dot.
        # Each tap is a lane-shifted view of the flat padded image; stacking
        # them along sublanes builds the im2col LHS entirely in VMEM/vregs.
        x1 = jnp.concatenate(
            [x[:, halo + off:halo + off + n_pad] for off in offsets], axis=0)
        y1 = jnp.dot(w1, x1, preferred_element_type=f32)          # (C1, n_pad)
        # f32 epilogue; the lane-dense mask zeroes the padding ring so conv2
        # sees an exact zero-padded feature image (never leaves VMEM).
        y1 = jnp.maximum(y1 + b1, 0.0) * mask1

        # ---- conv2 over the n_core central lanes (covers all real pixels),
        # again one K=9*C1 dot.
        x2 = jnp.concatenate(
            [y1[:, ws + off:ws + off + n_core] for off in offsets], axis=0)
        y2 = jnp.dot(w2, x2, preferred_element_type=f32)          # (C2, n_core)
        y2 = jnp.maximum(y2 + b2, 0.0) * mask2

        # ---- AdaptiveAvgPool2d(1) + Linear(C2 -> out_dim, padded to 128):
        # lane reduce for the pool, then a transpose-free broadcast-multiply +
        # sublane reduce against the lane-dense fc weight.
        pooled = jnp.sum(y2, axis=1, keepdims=True) * inv_hw      # (C2, 1)
        rows.append(jnp.sum(wfc * pooled, axis=0, keepdims=True) + bfc)

    out = rows[0] if bblk == 1 else jnp.concatenate(rows, axis=0)
    out_ref[0] = out.astype(out_ref.dtype)                        # (Bblk, 128)


def ranzcr_forward_padded(x_nchw, w1k, b1k, w2k, b2k, wfck, bfck, cin_p):
    """Fused trunk+head forward; returns the (B, 128) lane-padded fc output."""
    B, cin, H, W = x_nchw.shape
    wp = W + 2                               # padded image width
    n_pad = (H + 2) * wp                     # flattened 1-ring-padded image
    ws = wp + 1                              # max |shift| of a 3x3 tap
    n_core = n_pad - 2 * ws                  # central range covering all pixels
    halo = ws                                # zero lane-halo: shifts in-bounds
    n_tot = n_pad + 2 * halo
    outp = wfck.shape[-1]
    bblk = _pick_batch_block(B)
    nblk = B // bblk

    # NCHW -> channels-on-sublanes / flattened-padded-spatial-on-lanes, bf16.
    x = x_nchw.astype(jnp.float32)
    x = jnp.pad(x, ((0, 0), (0, cin_p - cin), (0, 0), (0, 0)))   # channel pad
    x = jnp.pad(x, ((0, 0), (0, 0), (1, 1), (1, 1)))             # spatial ring
    x = x.reshape(B, cin_p, n_pad)
    x = jnp.pad(x, ((0, 0), (0, 0), (halo, halo)))               # lane halo
    xpe = x.reshape(nblk, bblk, cin_p, n_tot).astype(jnp.bfloat16)

    # lane-dense interior mask over flattened padded positions.
    q = jnp.arange(n_pad, dtype=jnp.int32)
    row, col = q // wp, q % wp
    mask = (((row >= 1) & (row <= H) & (col >= 1) & (col <= W))
            .astype(jnp.float32)[None, :])                        # (1, n_pad)

    offsets = tuple((dy - 1) * wp + (dx - 1)
                    for dy in range(3) for dx in range(3))
    kernel = functools.partial(
        _fused_trunk_pool_fc_kernel, offsets=offsets, halo=halo, n_pad=n_pad,
        ws=ws, n_core=n_core, inv_hw=1.0 / float(H * W), bblk=bblk)

    out = pl.pallas_call(
        kernel,
        out_shape=jax.ShapeDtypeStruct((nblk, bblk, outp), jnp.float32),
        grid_spec=pltpu.PrefetchScalarGridSpec(
            num_scalar_prefetch=0,
            grid=(nblk,),                         # batch blocks, parallel
            in_specs=[
                pl.BlockSpec((1, bblk, cin_p, n_tot), lambda b: (b, 0, 0, 0)),
                pl.BlockSpec(mask.shape, lambda b: (0, 0)),
                pl.BlockSpec(w1k.shape, lambda b: (0, 0)),
                pl.BlockSpec(b1k.shape, lambda b: (0, 0)),
                pl.BlockSpec(w2k.shape, lambda b: (0, 0)),
                pl.BlockSpec(b2k.shape, lambda b: (0, 0)),
                pl.BlockSpec(wfck.shape, lambda b: (0, 0)),
                pl.BlockSpec(bfck.shape, lambda b: (0, 0)),
            ],
            out_specs=pl.BlockSpec((1, bblk, outp), lambda b: (b, 0, 0)),
        ),
        compiler_params=pltpu.CompilerParams(
            dimension_semantics=("parallel",),    # megacore gets both steps
            vmem_limit_bytes=_vmem_limit_bytes(),
        ),
    )(xpe, mask, w1k, b1k, w2k, b2k, wfck, bfck)
    return out.reshape(B, outp)


# ---------------------------------------------------------------------------
# Model wrapper (deterministic synthetic parameters)
# ---------------------------------------------------------------------------
class RANZCRResNet200DPallas:
    def __init__(self, in_chans=3, stem_chans=16, n_features=32, out_dim=11,
                 key=jax.random.PRNGKey(0)):
        k1, k2, k3, k4, k5, k6 = jax.random.split(key, 6)
        self.in_chans = in_chans
        self.stem_chans = stem_chans
        self.n_features = n_features
        self.out_dim = out_dim
        self.out_dim_padded = ((out_dim + 127) // 128) * 128   # lane-dense fc
        self.cin_p = ((in_chans + 15) // 16) * 16              # bf16 tile rows

        # TODO(synk): 2-layer conv stem stand-in for the full timm resnet200d trunk.
        w1 = jax.random.normal(k1, (3, 3, in_chans, stem_chans), jnp.float32) * 0.1
        w2 = jax.random.normal(k2, (3, 3, stem_chans, n_features), jnp.float32) * 0.1
        wfc = jax.random.normal(k3, (n_features, out_dim), jnp.float32) * 0.05
        b1 = jax.random.normal(k4, (stem_chans,), jnp.float32) * 0.01
        b2 = jax.random.normal(k5, (n_features,), jnp.float32) * 0.01
        bfc = jax.random.normal(k6, (out_dim,), jnp.float32) * 0.01

        # kernel-facing layouts:
        #   conv weights as (Cout, 9*Cin) with column index (3*dy+dx)*Cin + c,
        #   matching the tap/stacking order used inside the kernel.
        w1p = jnp.pad(w1, ((0, 0), (0, 0), (0, self.cin_p - in_chans), (0, 0)))
        self.w1k = (jnp.transpose(w1p, (3, 0, 1, 2))
                    .reshape(stem_chans, 9 * self.cin_p).astype(jnp.bfloat16))
        self.w2k = (jnp.transpose(w2, (3, 0, 1, 2))
                    .reshape(n_features, 9 * stem_chans).astype(jnp.float32))
        self.b1k = b1.reshape(stem_chans, 1)
        self.b2k = b2.reshape(n_features, 1)
        self.wfck = (jnp.zeros((n_features, self.out_dim_padded), jnp.float32)
                     .at[:, :out_dim].set(wfc))
        self.bfck = (jnp.zeros((1, self.out_dim_padded), jnp.float32)
                     .at[:, :out_dim].set(bfc))

        # f32 reference copies with the same rounding the kernel sees.
        self.w1_ref = w1.astype(jnp.bfloat16).astype(jnp.float32)
        self.w2_ref = w2
        self.wfc_ref = wfc
        self.b1_ref = b1
        self.b2_ref = b2
        self.bfc_ref = bfc

    @functools.partial(jax.jit, static_argnums=0)
    def __call__(self, x_nchw):
        out = ranzcr_forward_padded(x_nchw, self.w1k, self.b1k, self.w2k,
                                    self.b2k, self.wfck, self.bfck, self.cin_p)
        return out[:, :self.out_dim]                    # drop lane padding


# ---------------------------------------------------------------------------
# Pure-JAX reference (same bf16-rounded params / input) for correctness.
# ---------------------------------------------------------------------------
def _reference_forward(x_nchw, w1_hwio, b1, w2_hwio, b2, wfc, bfc):
    hi = jax.lax.Precision.HIGHEST
    x = jnp.transpose(x_nchw, (0, 2, 3, 1))
    x = x.astype(jnp.bfloat16).astype(jnp.float32)      # match kernel HBM dtype
    dn = ("NHWC", "HWIO", "NHWC")
    f = jax.lax.conv_general_dilated(x, w1_hwio, (1, 1), "SAME",
                                     dimension_numbers=dn, precision=hi)
    f = jnp.maximum(f + b1.reshape(1, 1, 1, -1), 0.0)
    f = jax.lax.conv_general_dilated(f, w2_hwio, (1, 1), "SAME",
                                     dimension_numbers=dn, precision=hi)
    f = jnp.maximum(f + b2.reshape(1, 1, 1, -1), 0.0)
    pooled = jnp.mean(f, axis=(1, 2))
    return jnp.dot(pooled, wfc, precision=hi) + bfc


if __name__ == "__main__":
    B, C, H, W = 2, 3, 16, 16
    x = jax.random.normal(jax.random.PRNGKey(0), (B, C, H, W), jnp.float32)

    model = RANZCRResNet200DPallas(in_chans=C, stem_chans=16, n_features=32,
                                   out_dim=11, key=jax.random.PRNGKey(0))
    out = jax.block_until_ready(model(x))
    assert out.shape == (B, 11), out.shape
    assert bool(jnp.all(jnp.isfinite(out)))

    ref = _reference_forward(x, model.w1_ref, model.b1_ref, model.w2_ref,
                             model.b2_ref, model.wfc_ref, model.bfc_ref)
    assert jnp.allclose(out, ref, atol=5e-3, rtol=5e-2), \
        float(jnp.max(jnp.abs(out - ref)))

    print("KERNEL_OK")
</pallas_src>

<mosaic_0001>
module attributes {stable_mosaic.version = 11 : i64} {
  func.func @_fused_trunk_pool_fc_kernel(%arg0: i32, %arg1: memref<1x1x16x362xbf16, #tpu.memory_space<vmem>>, %arg2: memref<1x324xf32, #tpu.memory_space<vmem>>, %arg3: memref<16x144xbf16, #tpu.memory_space<vmem>>, %arg4: memref<16x1xf32, #tpu.memory_space<vmem>>, %arg5: memref<32x144xf32, #tpu.memory_space<vmem>>, %arg6: memref<32x1xf32, #tpu.memory_space<vmem>>, %arg7: memref<32x128xf32, #tpu.memory_space<vmem>>, %arg8: memref<1x128xf32, #tpu.memory_space<vmem>>, %arg9: memref<1x1x128xf32, #tpu.memory_space<vmem>>) attributes {dimension_semantics = [#tpu.dimension_semantics<parallel>], iteration_bounds = array<i64: 2>, scalar_prefetch = 0 : i64, scratch_operands = 0 : i64, tpu.core_type = #tpu.core_type<tc>, window_params = [{transform_indices = @transform_0, window_bounds = array<i64: 1, 1, 16, 362>}, {pipeline_mode = #tpu.pipeline_mode<synchronous>, transform_indices = @transform_1, window_bounds = array<i64: 1, 324>}, {pipeline_mode = #tpu.pipeline_mode<synchronous>, transform_indices = @transform_2, window_bounds = array<i64: 16, 144>}, {pipeline_mode = #tpu.pipeline_mode<synchronous>, transform_indices = @transform_3, window_bounds = array<i64: 16, 1>}, {pipeline_mode = #tpu.pipeline_mode<synchronous>, transform_indices = @transform_4, window_bounds = array<i64: 32, 144>}, {pipeline_mode = #tpu.pipeline_mode<synchronous>, transform_indices = @transform_5, window_bounds = array<i64: 32, 1>}, {pipeline_mode = #tpu.pipeline_mode<synchronous>, transform_indices = @transform_6, window_bounds = array<i64: 32, 128>}, {pipeline_mode = #tpu.pipeline_mode<synchronous>, transform_indices = @transform_7, window_bounds = array<i64: 1, 128>}, {transform_indices = @transform_8, window_bounds = array<i64: 1, 1, 128>}]} {
    %c0 = arith.constant 0 : index
    %c0_0 = arith.constant 0 : index
    %0 = vector.load %arg2[%c0, %c0_0] : memref<1x324xf32, #tpu.memory_space<vmem>>, vector<1x324xf32>
    %1 = vector.extract_strided_slice %0 {offsets = [0, 19], sizes = [1, 286], strides = [1, 1]} : vector<1x324xf32> to vector<1x286xf32>
    %c0_1 = arith.constant 0 : index
    %c0_2 = arith.constant 0 : index
    %2 = vector.load %arg3[%c0_1, %c0_2] : memref<16x144xbf16, #tpu.memory_space<vmem>>, vector<16x144xbf16>
    %c0_3 = arith.constant 0 : index
    %c0_4 = arith.constant 0 : index
    %3 = vector.load %arg5[%c0_3, %c0_4] : memref<32x144xf32, #tpu.memory_space<vmem>>, vector<32x144xf32>
    %c0_5 = arith.constant 0 : index
    %c0_6 = arith.constant 0 : index
    %4 = vector.load %arg4[%c0_5, %c0_6] : memref<16x1xf32, #tpu.memory_space<vmem>>, vector<16x1xf32>
    %c0_7 = arith.constant 0 : index
    %c0_8 = arith.constant 0 : index
    %5 = vector.load %arg6[%c0_7, %c0_8] : memref<32x1xf32, #tpu.memory_space<vmem>>, vector<32x1xf32>
    %c0_9 = arith.constant 0 : index
    %c0_10 = arith.constant 0 : index
    %6 = vector.load %arg7[%c0_9, %c0_10] : memref<32x128xf32, #tpu.memory_space<vmem>>, vector<32x128xf32>
    %c0_11 = arith.constant 0 : index
    %c0_12 = arith.constant 0 : index
    %7 = vector.load %arg8[%c0_11, %c0_12] : memref<1x128xf32, #tpu.memory_space<vmem>>, vector<1x128xf32>
    %c0_13 = arith.constant 0 : index
    %c0_14 = arith.constant 0 : index
    %c0_15 = arith.constant 0 : index
    %c0_16 = arith.constant 0 : index
    %8 = vector.load %arg1[%c0_13, %c0_14, %c0_15, %c0_16] : memref<1x1x16x362xbf16, #tpu.memory_space<vmem>>, vector<1x1x16x362xbf16>
    %9 = vector.shape_cast %8 : vector<1x1x16x362xbf16> to vector<16x362xbf16>
    %10 = vector.extract_strided_slice %9 {offsets = [0, 0], sizes = [16, 324], strides = [1, 1]} : vector<16x362xbf16> to vector<16x324xbf16>
    %11 = vector.extract_strided_slice %9 {offsets = [0, 1], sizes = [16, 324], strides = [1, 1]} : vector<16x362xbf16> to vector<16x324xbf16>
    %12 = vector.extract_strided_slice %9 {offsets = [0, 2], sizes = [16, 324], strides = [1, 1]} : vector<16x362xbf16> to vector<16x324xbf16>
    %13 = vector.extract_strided_slice %9 {offsets = [0, 18], sizes = [16, 324], strides = [1, 1]} : vector<16x362xbf16> to vector<16x324xbf16>
    %14 = vector.extract_strided_slice %9 {offsets = [0, 19], sizes = [16, 324], strides = [1, 1]} : vector<16x362xbf16> to vector<16x324xbf16>
    %15 = vector.extract_strided_slice %9 {offsets = [0, 20], sizes = [16, 324], strides = [1, 1]} : vector<16x362xbf16> to vector<16x324xbf16>
    %16 = vector.extract_strided_slice %9 {offsets = [0, 36], sizes = [16, 324], strides = [1, 1]} : vector<16x362xbf16> to vector<16x324xbf16>
    %17 = vector.extract_strided_slice %9 {offsets = [0, 37], sizes = [16, 324], strides = [1, 1]} : vector<16x362xbf16> to vector<16x324xbf16>
    %18 = vector.extract_strided_slice %9 {offsets = [0, 38], sizes = [16, 324], strides = [1, 1]} : vector<16x362xbf16> to vector<16x324xbf16>
    %19 = tpu.concatenate %10, %11, %12, %13, %14, %15, %16, %17, %18 in 0 : vector<16x324xbf16>, vector<16x324xbf16>, vector<16x324xbf16>, vector<16x324xbf16>, vector<16x324xbf16>, vector<16x324xbf16>, vector<16x324xbf16>, vector<16x324xbf16>, vector<16x324xbf16> -> vector<144x324xbf16>
    %cst = arith.constant dense<0.000000e+00> : vector<16x324xf32>
    %20 = tpu.matmul %2, %19, %cst {dimension_numbers = #tpu.dot_dimension_numbers<[1], [0], [0], [1], [0, 0, 1, 1], [], []>} : vector<16x144xbf16>, vector<144x324xbf16>, vector<16x324xf32> -> vector<16x324xf32>
    %21 = vector.broadcast %4 : vector<16x1xf32> to vector<16x324xf32>
    %22 = arith.addf %20, %21 : vector<16x324xf32>
    %cst_17 = arith.constant 0.000000e+00 : f32
    %23 = vector.broadcast %cst_17 : f32 to vector<16x324xf32>
    %24 = arith.maximumf %22, %23 : vector<16x324xf32>
    %25 = vector.broadcast %0 : vector<1x324xf32> to vector<16x324xf32>
    %26 = arith.mulf %24, %25 : vector<16x324xf32>
    %27 = vector.extract_strided_slice %26 {offsets = [0, 0], sizes = [16, 286], strides = [1, 1]} : vector<16x324xf32> to vector<16x286xf32>
    %28 = vector.extract_strided_slice %26 {offsets = [0, 1], sizes = [16, 286], strides = [1, 1]} : vector<16x324xf32> to vector<16x286xf32>
    %29 = vector.extract_strided_slice %26 {offsets = [0, 2], sizes = [16, 286], strides = [1, 1]} : vector<16x324xf32> to vector<16x286xf32>
    %30 = vector.extract_strided_slice %26 {offsets = [0, 18], sizes = [16, 286], strides = [1, 1]} : vector<16x324xf32> to vector<16x286xf32>
    %31 = vector.extract_strided_slice %26 {offsets = [0, 19], sizes = [16, 286], strides = [1, 1]} : vector<16x324xf32> to vector<16x286xf32>
    %32 = vector.extract_strided_slice %26 {offsets = [0, 20], sizes = [16, 286], strides = [1, 1]} : vector<16x324xf32> to vector<16x286xf32>
    %33 = vector.extract_strided_slice %26 {offsets = [0, 36], sizes = [16, 286], strides = [1, 1]} : vector<16x324xf32> to vector<16x286xf32>
    %34 = vector.extract_strided_slice %26 {offsets = [0, 37], sizes = [16, 286], strides = [1, 1]} : vector<16x324xf32> to vector<16x286xf32>
    %35 = vector.extract_strided_slice %26 {offsets = [0, 38], sizes = [16, 286], strides = [1, 1]} : vector<16x324xf32> to vector<16x286xf32>
    %36 = tpu.concatenate %27, %28, %29, %30, %31, %32, %33, %34, %35 in 0 : vector<16x286xf32>, vector<16x286xf32>, vector<16x286xf32>, vector<16x286xf32>, vector<16x286xf32>, vector<16x286xf32>, vector<16x286xf32>, vector<16x286xf32>, vector<16x286xf32> -> vector<144x286xf32>
    %cst_18 = arith.constant dense<0.000000e+00> : vector<32x286xf32>
    %37 = tpu.matmul %3, %36, %cst_18 {dimension_numbers = #tpu.dot_dimension_numbers<[1], [0], [0], [1], [0, 0, 1, 1], [], []>} : vector<32x144xf32>, vector<144x286xf32>, vector<32x286xf32> -> vector<32x286xf32>
    %38 = vector.broadcast %5 : vector<32x1xf32> to vector<32x286xf32>
    %39 = arith.addf %37, %38 : vector<32x286xf32>
    %cst_19 = arith.constant 0.000000e+00 : f32
    %40 = vector.broadcast %cst_19 : f32 to vector<32x286xf32>
    %41 = arith.maximumf %39, %40 : vector<32x286xf32>
    %42 = vector.broadcast %1 : vector<1x286xf32> to vector<32x286xf32>
    %43 = arith.mulf %41, %42 : vector<32x286xf32>
    %cst_20 = arith.constant dense<0.000000e+00> : vector<32xf32>
    %44 = vector.multi_reduction <add>, %43, %cst_20 [1] : vector<32x286xf32> to vector<32xf32>
    %45 = vector.shape_cast %44 : vector<32xf32> to vector<32x1xf32>
    %cst_21 = arith.constant 3.906250e-03 : f32
    %46 = vector.broadcast %cst_21 : f32 to vector<32x1xf32>
    %47 = arith.mulf %45, %46 : vector<32x1xf32>
    %48 = vector.broadcast %47 : vector<32x1xf32> to vector<32x128xf32>
    %49 = arith.mulf %6, %48 : vector<32x128xf32>
    %cst_22 = arith.constant dense<0.000000e+00> : vector<128xf32>
    %50 = vector.multi_reduction <add>, %49, %cst_22 [0] : vector<32x128xf32> to vector<128xf32>
    %51 = vector.shape_cast %50 : vector<128xf32> to vector<1x128xf32>
    %52 = arith.addf %51, %7 : vector<1x128xf32>
    %c0_23 = arith.constant 0 : index
    %c0_24 = arith.constant 0 : index
    %c0_25 = arith.constant 0 : index
    %53 = vector.load %arg9[%c0_23, %c0_24, %c0_25] : memref<1x1x128xf32, #tpu.memory_space<vmem>>, vector<1x1x128xf32>
    %54 = vector.shape_cast %53 : vector<1x1x128xf32> to vector<1x128xf32>
    %55 = vector.shape_cast %52 : vector<1x128xf32> to vector<1x1x128xf32>
    tpu.vector_store %arg9[%c0_23, %c0_24, %c0_25], %55 {strides = array<i32>} : memref<1x1x128xf32, #tpu.memory_space<vmem>>, vector<1x1x128xf32>,
    return
  }
  func.func @transform_0(%arg0: i32) -> (i32, i32, i32, i32) {
    %c0_i32 = arith.constant 0 : i32
    %c0_i32_0 = arith.constant 0 : i32
    %c0_i32_1 = arith.constant 0 : i32
    %c0_i32_2 = arith.constant 0 : i32
    return %arg0, %c0_i32, %c0_i32_0, %c0_i32_1 : i32, i32, i32, i32
  }
  func.func @transform_1(%arg0: i32) -> (i32, i32) {
    %c0_i32 = arith.constant 0 : i32
    %c0_i32_0 = arith.constant 0 : i32
    %c0_i32_1 = arith.constant 0 : i32
    return %c0_i32, %c0_i32_0 : i32, i32
  }
  func.func @transform_2(%arg0: i32) -> (i32, i32) {
    %c0_i32 = arith.constant 0 : i32
    %c0_i32_0 = arith.constant 0 : i32
    %c0_i32_1 = arith.constant 0 : i32
    return %c0_i32, %c0_i32_0 : i32, i32
  }
  func.func @transform_3(%arg0: i32) -> (i32, i32) {
    %c0_i32 = arith.constant 0 : i32
    %c0_i32_0 = arith.constant 0 : i32
    %c0_i32_1 = arith.constant 0 : i32
    return %c0_i32, %c0_i32_0 : i32, i32
  }
  func.func @transform_4(%arg0: i32) -> (i32, i32) {
    %c0_i32 = arith.constant 0 : i32
    %c0_i32_0 = arith.constant 0 : i32
    %c0_i32_1 = arith.constant 0 : i32
    return %c0_i32, %c0_i32_0 : i32, i32
  }
  func.func @transform_5(%arg0: i32) -> (i32, i32) {
    %c0_i32 = arith.constant 0 : i32
    %c0_i32_0 = arith.constant 0 : i32
    %c0_i32_1 = arith.constant 0 : i32
    return %c0_i32, %c0_i32_0 : i32, i32
  }
  func.func @transform_6(%arg0: i32) -> (i32, i32) {
    %c0_i32 = arith.constant 0 : i32
    %c0_i32_0 = arith.constant 0 : i32
    %c0_i32_1 = arith.constant 0 : i32
    return %c0_i32, %c0_i32_0 : i32, i32
  }
  func.func @transform_7(%arg0: i32) -> (i32, i32) {
    %c0_i32 = arith.constant 0 : i32
    %c0_i32_0 = arith.constant 0 : i32
    %c0_i32_1 = arith.constant 0 : i32
    return %c0_i32, %c0_i32_0 : i32, i32
  }
  func.func @transform_8(%arg0: i32) -> (i32, i32, i32) {
    %c0_i32 = arith.constant 0 : i32
    %c0_i32_0 = arith.constant 0 : i32
    %c0_i32_1 = arith.constant 0 : i32
    return %arg0, %c0_i32, %c0_i32_0 : i32, i32, i32
  }
}

</mosaic_0001>

<bundles_post_ra>
// kernel: a_call__.1
= control target key start
LH: loop header
LB: loop body
LE: loop exit
PB: predicated region body
PF: predicated region fallthrough
CT: control target
= control target key end

     0   :  { %s2566_s0 = inlined_call_operand.hbm [shape: bf16[2,1,16,362], index: 0, kind: input, shape index: {}]   ;;  %s2567_s1 = inlined_call_operand.hbm [shape: f32[1,324], index: 1, kind: input, shape index: {}]   ;;  %s2568_s2 = inlined_call_operand.hbm [shape: bf16[16,144], index: 2, kind: input, shape index: {}]   ;;  %s2569_s3 = inlined_call_operand.hbm [shape: f32[16,1], index: 3, kind: input, shape index: {}]   ;;  %s2570_s4 = inlined_call_operand.hbm [shape: f32[32,144], index: 4, kind: input, shape index: {}]   ;;  %s2571_s5 = inlined_call_operand.hbm [shape: f32[32,1], index: 5, kind: input, shape index: {}]   ;;  %s2572_s6 = inlined_call_operand.hbm [shape: f32[32,128], index: 6, kind: input, shape index: {}]   ;;  %s2573_s7 = inlined_call_operand.hbm [shape: f32[1,128], index: 7, kind: input, shape index: {}]   ;;  %s2574_s8 = inlined_call_operand.hbm [shape: f32[2,1,128], index: 8, kind: output, shape index: {}]  }
   0x1   :  { %2580 = sst [smem:[#allocation23_spill]] %s2567_s1 }
   0x2   :  { %2581 = sst [smem:[#allocation24_spill]] %s2568_s2 }
   0x3   :  { %13 = vsyncpa [#allocation3], 0 }
   0x4   :  { %15 = vsyncpa [#allocation3 + $0x1], 0 }
   0x5   :  { %16 = vsyncpa [#allocation6], 0 }
   0x6   :  { %17 = vsyncpa [#allocation9], 0 }
   0x7   :  { %18 = vsyncpa [#allocation12], 0 }
   0x8   :  { %19 = vsyncpa [#allocation15], 0 }
   0x9   :  { %20 = vsyncpa [#allocation4], 0 }
   0xa   :  { %22 = vsyncpa [#allocation4 + $0x1], 0  ;;  %s2057_s27 = smov 0   ;;  %s2059_s28 = smov 0  }
   0xb   :  { %s2061_s29 = smov 0   ;;  %s2063_s30 = smov 0  }
   0xc LB: > { %s1987_s9 = smov [#allocation5]   ;;  %s2078_s11 = sadd.s32 4294967295, %s1985_s30   ;;  %s1985_s30 = sphi %s2063_s30, %s2609_s30   ;;  %s1981_s29 = sphi %s2061_s29, %s2608_s29   ;;  %s1977_s28 = sphi %s2059_s28, %s2607_s28   ;;  %s1973_s27 = sphi %s2057_s27, %s2606_s27  }
   0xd   : > { %s245_s10 = sshll.u32 %s1987_s9, 4  ;;  %p1313_p0 = scmp.ge.s32.totalorder %s1985_s30, 1  ;;  %s2083_s10 = int_to_ptr.vmem [resolvable:$true] %s245_s10 }
   0xe   : > { %p2575_p1 = scmp.eq.s32.totalorder %s2078_s11, 0  ;;  %p232_p2 = scmp.lt.s32.totalorder %s1985_s30, 3 }
   0xf   : > { %s1988_s13 = smov [#allocation8]   ;;  %s1989_s16 = smov [#allocation11]  }
  0x10   : > { %p2085_p3 = pnand %p1313_p0, %p232_p2  ;;  %s268_s14 = sshll.u32 %s1988_s13, 4  ;;  %s2098_s14 = int_to_ptr.vmem [resolvable:$true] %s268_s14 }
  0x11   : > { %s294_s17 = sshll.u32 %s1989_s16, 4  ;;  %s2584_s1 = sld [smem:[#allocation23_spill]]  ;;  %s2100_s17 = int_to_ptr.vmem [resolvable:$true] %s294_s17 }
  0x12   : > { %s2582_s12 = scalar_select %p2085_p3, 1, 0 }
  0x13   : > { %p1447_p5 = pneg %p2085_p3 }
  0x15   : > { %p2094_p6 = pnand %p1447_p5, %p2575_p1 }
  0x17   : > { %s1677_s20 = scalar_lea.hbm %s2584_s1, 48  ;;  %p2110_p8 = pneg %p2094_p6 }
  0x18   : > { %p1678_p7 = scmp.ne.s32.totalorder %s2584_s1, %s1677_s20  ;;  %p1684_p11 = scmp.lt.u32.totalorder %s1677_s20, %s2584_s1 }
  0x1a   : > { %p1680_p9 = pnand %p2110_p8, %p1678_p7 }
  0x1c   : > { %p1681_p10 = pneg %p1680_p9 }
  0x1e   : > { %p1686_p12 = pnand %p1684_p11, %p1681_p10 }
  0x20   : > { %1689 = shalt.err (!%p1686_p12)
}
  0x21   : > { %s1690_s26 = scalar_lea.vmem %s2083_s10, 48  ;;  %s1697_s9 = scalar_lea.vmem %s2083_s10, 64 }
  0x22   : > { %p1691_p13 = scmp.ne.s32.totalorder %s2083_s10, %s1690_s26  ;;  %p1698_p5 = scmp.lt.s32.totalorder %s2083_s10, %s2083_s10 }
  0x23   : > { %p1699_p7 = scmp.lt.s32.totalorder %s1697_s9, %s1690_s26 }
  0x24   : > { %p1693_p0 = pnand %p1691_p13, %p2110_p8 }
  0x25   : > { %p1700_p9 = por %p1699_p7, %p1698_p5 }
  0x26   : > { %p1694_p2 = pneg %p1693_p0 }
  0x28   : > { %p1701_p4 = pnand %p1700_p9, %p1694_p2 }
  0x2a   : > { %1704 = shalt.err (!%p1701_p4)
}
  0x2b   : > { %1450 = dma.hbm_to_vmem [thread:$0]  (!%p2094_p6), %s2584_s1, 48, %s2083_s10, [#allocation6]  }
  0x2c   : > { %s1705_s20 = scalar_lea.hbm %s2569_s3, 256 }
  0x2d   : > { %p1706_p10 = scmp.ne.s32.totalorder %s2569_s3, %s1705_s20  ;;  %p1712_p4 = scmp.lt.u32.totalorder %s1705_s20, %s2569_s3 }
  0x2f   : > { %p1708_p11 = pnand %p1706_p10, %p2110_p8 }
  0x31   : > { %p1709_p12 = pneg %p1708_p11 }
  0x33   : > { %p1714_p13 = pnand %p1712_p4, %p1709_p12 }
  0x35   : > { %1717 = shalt.err (!%p1714_p13)
}
  0x36   : > { %s1718_s10 = scalar_lea.vmem %s2098_s14, 256  ;;  %p1726_p7 = scmp.lt.s32.totalorder %s2098_s14, %s2098_s14 }
  0x37   : > { %p1719_p0 = scmp.ne.s32.totalorder %s2098_s14, %s1718_s10  ;;  %p1727_p9 = scmp.lt.s32.totalorder %s1718_s10, %s1718_s10 }
  0x39   : > { %p1721_p2 = pnand %p1719_p0, %p2110_p8  ;;  %p1728_p10 = por %p1727_p9, %p1726_p7 }
  0x3b   : > { %p1722_p5 = pneg %p1721_p2 }
  0x3d   : > { %p1729_p11 = pnand %p1728_p10, %p1722_p5 }
  0x3f   : > { %1732 = shalt.err (!%p1729_p11)
}
  0x40   : > { %s2577_s26 = smov 128   ;;  %s2578_s9 = smov 8  }
  0x41   : > { %1456 = dma.hbm_to_vmem [thread:$0]  (!%p2094_p6), %s2569_s3, 256, %s2098_s14, [#allocation9], %s2577_s26, %s2577_s26, %s2578_s9  }
  0x42   : > { %s1733_s20 = scalar_lea.hbm %s2571_s5, 512 }
  0x43   : > { %p1734_p12 = scmp.ne.s32.totalorder %s2571_s5, %s1733_s20  ;;  %p1740_p0 = scmp.lt.u32.totalorder %s1733_s20, %s2571_s5 }
  0x45   : > { %p1736_p4 = pnand %p1734_p12, %p2110_p8 }
  0x47   : > { %p1737_p13 = pneg %p1736_p4 }
  0x49   : > { %p1742_p2 = pnand %p1740_p0, %p1737_p13 }
  0x4b   : > { %1745 = shalt.err (!%p1742_p2)
}
  0x4c   : > { %s1746_s14 = scalar_lea.vmem %s2100_s17, 512  ;;  %p1754_p10 = scmp.lt.s32.totalorder %s2100_s17, %s2100_s17 }
  0x4d   : > { %p1747_p5 = scmp.ne.s32.totalorder %s2100_s17, %s1746_s14  ;;  %p1755_p11 = scmp.lt.s32.totalorder %s1746_s14, %s1746_s14 }
  0x4f   : > { %p1749_p7 = pnand %p1747_p5, %p2110_p8  ;;  %p1756_p12 = por %p1755_p11, %p1754_p10 }
  0x51   : > { %p1750_p9 = pneg %p1749_p7 }
  0x53   : > { %p1757_p4 = pnand %p1756_p12, %p1750_p9 }
  0x55   : > { %1760 = shalt.err (!%p1757_p4)
}
  0x56   : > { %1462 = dma.hbm_to_vmem [thread:$0]  (!%p2094_p6), %s2571_s5, 512, %s2100_s17, [#allocation12], %s2577_s26, %s2577_s26, %s2578_s9  }
  0x57   : > { %s1992_s16 = smov [#allocation7]   ;;  %s1993_s19 = smov [#allocation10]  }
  0x58   : > { %s255_s18 = sshll.u32 %s1992_s16, 4  ;;  %s281_s20 = sshll.u32 %s1993_s19, 4  ;;  %s256_s18 = int_to_ptr.vmem [resolvable:$true] %s255_s18  ;;  %s282_s20 = int_to_ptr.vmem [resolvable:$true] %s281_s20 }
  0x59   : > { %s2586_s2 = sld [smem:[#allocation24_spill]] }
  0x5f   : > { %s1761_s24 = scalar_lea.hbm %s2586_s2, 256 }
  0x60   : > { %p1762_p13 = scmp.ne.s32.totalorder %s2586_s2, %s1761_s24  ;;  %p1768_p5 = scmp.lt.u32.totalorder %s1761_s24, %s2586_s2 }
  0x62   : > { %p1764_p0 = pnand %p1762_p13, %p2110_p8 }
  0x64   : > { %p1765_p2 = pneg %p1764_p0 }
  0x66   : > { %p1770_p7 = pnand %p1768_p5, %p1765_p2 }
  0x68   : > { %1773 = shalt.err (!%p1770_p7)
}
  0x69   : > { %s1774_s17 = scalar_lea.vmem %s256_s18, 256  ;;  %p1782_p12 = scmp.lt.s32.totalorder %s256_s18, %s256_s18 }
  0x6a   : > { %p1775_p9 = scmp.ne.s32.totalorder %s256_s18, %s1774_s17  ;;  %p1783_p4 = scmp.lt.s32.totalorder %s1774_s17, %s1774_s17 }
  0x6c   : > { %p1777_p10 = pnand %p1775_p9, %p2110_p8  ;;  %p1784_p1 = por %p1783_p4, %p1782_p12 }
  0x6e   : > { %p1778_p11 = pneg %p1777_p10 }
  0x70   : > { %p1785_p3 = pnand %p1784_p1, %p1778_p11 }
  0x72   : > { %1788 = shalt.err (!%p1785_p3)
}
  0x73   : > { %1453 = dma.hbm_to_vmem [thread:$0]  (!%p2094_p6), %s2586_s2, 256, %s256_s18, [#allocation6], %s2577_s26, %s2577_s26, %s2578_s9  }
  0x74   : > { %s1789_s21 = scalar_lea.hbm %s2570_s4, 1024 }
  0x75   : > { %p1790_p1 = scmp.ne.s32.totalorder %s2570_s4, %s1789_s21  ;;  %p1796_p0 = scmp.lt.u32.totalorder %s1789_s21, %s2570_s4 }
  0x77   : > { %p1792_p3 = pnand %p1790_p1, %p2110_p8 }
  0x79   : > { %p1793_p13 = pneg %p1792_p3 }
  0x7b   : > { %p1798_p2 = pnand %p1796_p0, %p1793_p13 }
  0x7d   : > { %1801 = shalt.err (!%p1798_p2)
}
  0x7e   : > { %s1802_s10 = scalar_lea.vmem %s282_s20, 1024  ;;  %p1810_p10 = scmp.lt.s32.totalorder %s282_s20, %s282_s20 }
  0x7f   : > { %p1803_p5 = scmp.ne.s32.totalorder %s282_s20, %s1802_s10  ;;  %p1811_p11 = scmp.lt.s32.totalorder %s1802_s10, %s1802_s10 }
  0x81   : > { %p1805_p7 = pnand %p1803_p5, %p2110_p8  ;;  %p1812_p12 = por %p1811_p11, %p1810_p10 }
  0x83   : > { %p1806_p9 = pneg %p1805_p7 }
  0x85   : > { %p1813_p4 = pnand %p1812_p12, %p1806_p9 }
  0x87   : > { %1816 = shalt.err (!%p1813_p4)
}
  0x88   : > { %s1994_s18 = smov 256   ;;  %s1995_s17 = smov 16  }
  0x89   : > { %1459 = dma.hbm_to_vmem [thread:$0]  (!%p2094_p6), %s2570_s4, 1024, %s282_s20, [#allocation9], %s1994_s18, %s1994_s18, %s1995_s17  }
  0x8a   : > { %s1996_s16 = smov [#allocation13]   ;;  %s1997_s21 = smov [#allocation14]  }
  0x8b   : > { %s307_s19 = sshll.u32 %s1996_s16, 4  ;;  %s321_s22 = sshll.u32 %s1997_s21, 4  ;;  %s308_s19 = int_to_ptr.vmem [resolvable:$true] %s307_s19  ;;  %s322_s22 = int_to_ptr.vmem [resolvable:$true] %s321_s22 }
  0x8c   : > { %s1817_s14 = scalar_lea.hbm %s2572_s6, 512 }
  0x8d   : > { %p1818_p1 = scmp.ne.s32.totalorder %s2572_s6, %s1817_s14  ;;  %p1824_p0 = scmp.lt.u32.totalorder %s1817_s14, %s2572_s6 }
  0x8f   : > { %p1820_p3 = pnand %p1818_p1, %p2110_p8 }
  0x91   : > { %p1821_p13 = pneg %p1820_p3 }
  0x93   : > { %p1826_p2 = pnand %p1824_p0, %p1821_p13 }
  0x95   : > { %1829 = shalt.err (!%p1826_p2)
}
  0x96   : > { %s1830_s20 = scalar_lea.vmem %s308_s19, 512  ;;  %p1838_p10 = scmp.lt.s32.totalorder %s308_s19, %s308_s19 }
  0x97   : > { %p1831_p5 = scmp.ne.s32.totalorder %s308_s19, %s1830_s20  ;;  %p1839_p11 = scmp.lt.s32.totalorder %s1830_s20, %s1830_s20 }
  0x99   : > { %p1833_p7 = pnand %p1831_p5, %p2110_p8  ;;  %p1840_p12 = por %p1839_p11, %p1838_p10 }
  0x9b   : > { %p1834_p9 = pneg %p1833_p7 }
  0x9d   : > { %p1841_p4 = pnand %p1840_p12, %p1834_p9 }
  0x9f   : > { %1844 = shalt.err (!%p1841_p4)
}
  0xa0   : > { %s2587_s26 = smov 8   ;;  %s2588_s18 = smov 128  }
  0xa1   : > { %1465 = dma.hbm_to_vmem [thread:$0]  (!%p2094_p6), %s2572_s6, 512, %s308_s19, [#allocation12], %s2588_s18, %s2588_s18, %s2587_s26  }
  0xa2   : > { %s1845_s13 = scalar_lea.hbm %s2573_s7, 16 }
  0xa3   : > { %p1846_p1 = scmp.ne.s32.totalorder %s2573_s7, %s1845_s13  ;;  %p1852_p0 = scmp.lt.u32.totalorder %s1845_s13, %s2573_s7 }
  0xa5   : > { %p1848_p3 = pnand %p1846_p1, %p2110_p8 }
  0xa7   : > { %p1849_p13 = pneg %p1848_p3 }
  0xa9   : > { %p1854_p2 = pnand %p1852_p0, %p1849_p13 }
  0xab   : > { %1857 = shalt.err (!%p1854_p2)
}
  0xac   : > { %s1858_s14 = scalar_lea.vmem %s322_s22, 16  ;;  %s1865_s19 = scalar_lea.vmem %s322_s22, 32 }
  0xad   : > { %p1859_p5 = scmp.ne.s32.totalorder %s322_s22, %s1858_s14  ;;  %p1866_p10 = scmp.lt.s32.totalorder %s322_s22, %s322_s22 }
  0xae   : > { %p1867_p11 = scmp.lt.s32.totalorder %s1865_s19, %s1858_s14 }
  0xaf   : > { %p1861_p7 = pnand %p1859_p5, %p2110_p8 }
  0xb0   : > { %p1868_p12 = por %p1867_p11, %p1866_p10 }
  0xb1   : > { %p1862_p9 = pneg %p1861_p7 }
  0xb3   : > { %p1869_p4 = pnand %p1868_p12, %p1862_p9 }
  0xb5   : > { %1872 = shalt.err (!%p1869_p4)
}
  0xb6   : > { %1468 = dma.hbm_to_vmem [thread:$0]  (!%p2094_p6), %s2573_s7, 16, %s322_s22, [#allocation15]  }
  0xb7   : > { %s1312_s23 = sadd.s32 4294967294, %s1985_s30   ;;  %s2264_s15 = sadd.s32 1, %s1985_s30  }
  0xb8   : > { %s35_s26 = sadd.s32 1, %s1981_s29  ;;  %s32_s18 = ssub.s32 %s1985_s30, %s2264_s15 }
  0xb9   : > { %p42_p8 = scmp.ne.s32.totalorder %s1981_s29, %s1977_s28  ;;  %p33_p1 = scmp.eq.s32.totalorder %s32_s18, 0 }
  0xba   : > { %p43_p3 = scmp.eq.s32.totalorder %s1985_s30, 0  ;;  %p48_p13 = scmp.ne.s32.totalorder %s1977_s28, %s1973_s27 }
  0xbb   : > { %p219_p0 = scmp.eq.s32.totalorder %s2078_s11, 1  ;;  %p2589_p5 = scmp.eq.s32.totalorder %s2078_s11, 0 }
  0xbc   : > { %s2276_s2 = scalar_select %p33_p1, %s1981_s29, %s35_s26  }
  0xbd   : > { %p44_p2 = por %p43_p3, %p42_p8  ;;  %p2280_p7 = por %p2589_p5, %p48_p13 }
  0xbe   : > { %p2284_p6 = por %p219_p0, %p42_p8  ;;  %p225_p9 = scmp.eq.s32.totalorder %s1312_s23, 1 }
  0xbf   : > { %p1484_p10 = scmp.lt.s32.totalorder %s1985_s30, 2  ;;  %s332_s17 = sand.u32 1, %s1981_s29  }
  0xc0   : > { %s2591_s22 = scalar_select %p2284_p6, 1, 0 }
  0xc1   : > { %p2290_p11 = por %p225_p9, %p48_p13  ;;  %s1412_s13 = smul.u32 24, %s332_s17 }
  0xc2   : > { %p2294_p12 = pnand %p1484_p10, %p44_p2  ;;  %s1413_s21 = smul.u32 384, %s1985_s30 }
  0xc3   : > { %s2592_s1 = scalar_select %p2290_p11, 1, 0 }
  0xc4   : > { %s2302_s14 = scalar_lea.hbm %s2566_s0, %s1413_s21  ;;  %s336_s19 = scalar_lea.vmem [#allocation2], %s1412_s13 }
  0xc5   : > { %s343_s10 = sshll.u32 %s336_s19, 4  ;;  %s2306_s20 = scalar_lea.sflag [#allocation3], %s332_s17  ;;  %s2304_s10 = int_to_ptr.vmem [resolvable:$true] %s343_s10 }
  0xc6   : > { %s1873_s23 = scalar_lea.hbm %s2302_s14, 384  ;;  %p1875_p8 = pneg %p2294_p12 }
  0xc7   : > { %p1874_p4 = scmp.ne.s32.totalorder %s2302_s14, %s1873_s23  ;;  %s1878_s21 = scalar_lea.hbm %s2566_s0, 768 }
  0xc8   : > { %p1879_p13 = scmp.lt.u32.totalorder %s2302_s14, %s2566_s0  ;;  %p1880_p0 = scmp.lt.u32.totalorder %s1878_s21, %s1873_s23 }
  0xc9   : > { %p1876_p1 = pnand %p1875_p8, %p1874_p4  ;;  %p1882_p5 = scmp.lt.u32.totalorder %s1873_s23, %s2302_s14 }
  0xca   : > { %p1881_p2 = por %p1880_p0, %p1879_p13 }
  0xcb   : > { %p1877_p3 = pneg %p1876_p1 }
  0xcc   : > { %p1883_p9 = por %p1882_p5, %p1881_p2 }
  0xce   : > { %p1884_p10 = pnand %p1883_p9, %p1877_p3 }
  0xd0   : > { %1887 = shalt.err (!%p1884_p10)
}
  0xd1   : > { %s1888_s17 = scalar_lea.vmem %s2304_s10, 384  ;;  %s1998_s13 = smov [#allocation2]  }
  0xd2   : > { %p1889_p4 = scmp.ne.s32.totalorder %s2304_s10, %s1888_s17  ;;  %s1893_s19 = sshll.u32 %s1998_s13, 4  ;;  %s1894_s19 = int_to_ptr.vmem [resolvable:$false] %s1893_s19 }
  0xd3   : > { %s1895_s26 = scalar_lea.vmem %s1894_s19, 768  ;;  %p1896_p6 = scmp.lt.s32.totalorder %s2304_s10, %s1894_s19 }
  0xd4   : > { %p1891_p1 = pnand %p1889_p4, %p1875_p8  ;;  %p1897_p13 = scmp.lt.s32.totalorder %s1895_s26, %s1888_s17 }
  0xd6   : > { %p1892_p11 = pneg %p1891_p1  ;;  %p1898_p0 = por %p1897_p13, %p1896_p6 }
  0xd8   : > { %p1899_p2 = pnand %p1898_p0, %p1892_p11 }
  0xda   : > { %1902 = shalt.err (!%p1899_p2)
}
  0xdb   : > { %s1999_s23 = smov 192   ;;  %s2000_s18 = smov 12  }
  0xdc   : > { %1472 = dma.hbm_to_vmem [thread:$0]  (!%p2294_p12), %s2302_s14, 384, %s2304_s10, %s2306_s20, %s1999_s23, %s1999_s23, %s2000_s18  }
  0xdd   : > { %p2594_p8 = scmp.ne.s32.totalorder %s2582_s12, 0 }
  0xde   : > { %s2337_s21 = sand.u32 (!%p2594_p8), 1, %s1977_s28  }
  0xdf   : > { %355 = sbr.rel (%p2594_p8) target bundleno = 1210 (0x4ba), region = 52  ;;  %s358_s25 = scalar_lea.sflag (!%p2594_p8), [#allocation3], %s2337_s21 }
  0xe0   : > { %s1414_s24 = smul.u32 (!%p2594_p8), 24, %s2337_s21 }
  0xe2   : > { %s361_s17 = scalar_lea.vmem (!%p2594_p8), [#allocation2], %s1414_s24 }
  0xe6   : > { %1948 = dma.done.wait (%p2280_p7), %s358_s25, 384  }
  0xe7   : > { %1950 = vsyncadd (%p2280_p7), %s358_s25, 4294966912  ;;  %p2595_p6 = scmp.eq.s32.totalorder %s2078_s11, 0 }
  0xe9   : > { %1952 = dma.done.wait (%p2595_p6), [#allocation6], 304   ;;  %p2596_p11 = pmov %p2595_p6 }
  0xea   : > { %p2597_p12 = pmov %p2595_p6 }
  0xeb   : > { %1954 = vsyncadd (%p2596_p11), [#allocation6], 4294966992 }
  0xec   : > { %1956 = dma.done.wait (%p2597_p12), [#allocation9], 1280   ;;  %p2598_p3 = pmov %p2595_p6 }
  0xee   : > { %1958 = vsyncadd (%p2598_p3), [#allocation9], 4294966016  ;;  %p2599_p5 = pmov %p2598_p3 }
  0xef   : > { %p2600_p9 = pmov %p2598_p3 }
  0xf0   : > { %1960 = dma.done.wait (%p2599_p5), [#allocation12], 1024  }
  0xf1   : > { %1962 = vsyncadd (%p2600_p9), [#allocation12], 4294966272  ;;  %p2601_p7 = pmov %p2598_p3 }
  0xf2   : > { %p2602_p10 = pmov %p2598_p3 }
  0xf3   : > { %1964 = dma.done.wait (%p2601_p7), [#allocation15], 16  }
  0xf4   : > { %1966 = vsyncadd (%p2602_p10), [#allocation15], 4294967280  ;;  %v2001_v0 = vmov 0   ;;  %v1670_v1 = vld [vmem:[%s361_s17 + $0x4] ss:$12 sps:$4 sm:$0xff]   ;;  %s2002_s12 = smov 127   ;;  %v674_v49 = vlaneseq }
  0xf5   : > { %626 = vmatprep.subr.bf16.mxu1 %v2001_v0  ;;  %1548 = vset.pattern.permute.xlu0 %v2001_v0  ;;  %v1672_v2 = vld [vmem:[%s361_s17] ss:$12 sps:$4 sm:$0xff]   ;;  %v1673_v3 = vld [vmem:[%s361_s17 + $0x8] ss:$12 sps:$4 sm:$0xff]   ;;  %s2003_s9 = smov 126   ;;  %s2004_s16 = smov 110  }
  0xf6   : > { %1549 = vset.pattern.permute.xlu1 %v2001_v0  ;;  %466 = vrot.lane.b32.xlu0 %v1670_v1, %s2002_s12  ;;  %s2005_s14 = smov 109   ;;  %s2006_s10 = smov 108   ;;  %v1676_v4 = vld [vmem:[#allocation7 + $0x4] ss:$8 sps:$4 sm:$0xff]   ;;  %vm579_vm0 = vcmask 130048   ;;  %v433_v5 = vld [vmem:[#allocation8] sm:$0xff] }
  0xf7   : > { %583 = vmatprep.subr.bf16.mxu0 %v1670_v1  ;;  %464 = vrot.lane.b32.xlu1 %v1672_v2, %s2002_s12  ;;  %s2007_s20 = smov 92   ;;  %s2008_s13 = smov 91   ;;  %v434_v6 = vld [vmem:[#allocation8 + $0x8] sm:$0xff]  ;;  %vm470_vm1 = vcmask 1039360   ;;  %vm482_vm2 = vcmask 1031168   ;;  %vm494_vm3 = vcmask 900096  }
  0xf8   : > { %584 = vmatpush1.bf16.msra.mxu0 %v1672_v2  ;;  %627 = vmatpush1.bf16.msra.mxu1 %v1673_v3  ;;  %s2009_s19 = smov 90   ;;  %vm506_vm4 = vcmask 891904   ;;  %vm518_vm5 = vcmask 883712   ;;  %vm530_vm6 = vcmask 752640   ;;  %vm542_vm7 = vcmask 744448   ;;  %s1346_s26 = sshll.u32 %s2078_s11, 4 }
  0xf9   : > { %628 = vmatprep.subr.bf16.mxu1 %v2001_v0  ;;  %1337 = vmatprep.mubr.msk.bf16.mxu1 %vm579_vm0, %v1676_v4  ;;  %vm554_vm8 = vcmask 736256   ;;  %v1674_v44 = vld [vmem:[#allocation7] ss:$8 sps:$4 sm:$0xff]   ;;  %v2010_v48 = vmov 0.0|0.0   ;;  %v675_v50 = vshrl.u32 %v674_v49, 7  ;;  %vm1127_vm9 = vcmask 244736   ;;  %s2522_s17 = scalar_lea.hbm %s2574_s8, %s1346_s26 }
  0xfa   : > { %468 = vrot.lane.b32.xlu0 %v1673_v3, %s2002_s12  ;;  %1336 = vmatprep.mubr.msk.bf16.mxu0 %vm579_vm0, %v1676_v4  ;;  %v422_v53 = vld [vmem:[#allocation5] sm:$0x7]  ;;  %s420_s23 = scalar_lea.vmem [#allocation16], %s2337_s21  ;;  %p2603_p1 = scmp.ne.s32.totalorder %s2591_s22, 0 }
  0xfb   : > { %478 = vrot.lane.b32.xlu1 %v1670_v1, %s2003_s9  ;;  %v684_v51 = vsub.s32 2, %v675_v50  ;;  %v676_v55 = vsub.s32 0, %v675_v50  ;;  %v680_v57 = vsub.s32 1, %v675_v50  ;;  %s1179_s18 = sshll.u32 %s420_s23, 4  ;;  %s2011_s11 = smov [#allocation16]   ;;  %s2524_s18 = int_to_ptr.vmem [resolvable:$true] %s1179_s18 }
  0xfd   : > { %v2415_v60 = vrot.slane %v422_v53, %v684_v51  ;;  %v677_v4 = vrot.slane %v422_v53, %v676_v55 }
  0xfe   : > { %480 = vrot.lane.b32.xlu0 %v1673_v3, %s2003_s9 }
  0xff   : > { %476 = vrot.lane.b32.xlu1 %v1672_v2, %s2003_s9 }
 0x102   : > { %490 = vrot.lane.b32.xlu0 %v1670_v1, %s2004_s16 }
 0x103   : > { %492 = vrot.lane.b32.xlu1 %v1673_v3, %s2004_s16 }
 0x106   : > { %488 = vrot.lane.b32.xlu0 %v1672_v2, %s2004_s16 }
 0x107   : > { %502 = vrot.lane.b32.xlu1 %v1670_v1, %s2005_s14 }
 0x10a   : > { %504 = vrot.lane.b32.xlu0 %v1673_v3, %s2005_s14 }
 0x10b   : > { %500 = vrot.lane.b32.xlu1 %v1672_v2, %s2005_s14 }
 0x10e   : > { %514 = vrot.lane.b32.xlu0 %v1670_v1, %s2006_s10 }
 0x10f   : > { %516 = vrot.lane.b32.xlu1 %v1673_v3, %s2006_s10 }
 0x112   : > { %512 = vrot.lane.b32.xlu0 %v1672_v2, %s2006_s10 }
 0x113   : > { %526 = vrot.lane.b32.xlu1 %v1670_v1, %s2007_s20 }
 0x116   : > { %528 = vrot.lane.b32.xlu0 %v1673_v3, %s2007_s20 }
 0x117   : > { %524 = vrot.lane.b32.xlu1 %v1672_v2, %s2007_s20 }
 0x11a   : > { %538 = vrot.lane.b32.xlu0 %v1670_v1, %s2008_s13 }
 0x11b   : > { %540 = vrot.lane.b32.xlu1 %v1673_v3, %s2008_s13 }
 0x11e   : > { %536 = vrot.lane.b32.xlu0 %v1672_v2, %s2008_s13 }
 0x11f   : > { %550 = vrot.lane.b32.xlu1 %v1670_v1, %s2009_s19 }
 0x122   : > { %552 = vrot.lane.b32.xlu0 %v1673_v3, %s2009_s19 }
 0x123   : > { %548 = vrot.lane.b32.xlu1 %v1672_v2, %s2009_s19 }
 0x126   : > { %562 = vperm.xlu0 %1548, %v433_v5  }
 0x127   : > { %567 = vperm.xlu1 %1549, %v434_v6   ;;  %v681_v6 = vrot.slane %v422_v53, %v680_v57 }
 0x168   : > { %v467_v7 = vpop.permute.xlu0 %466 }
 0x169   : > { %v465_v8 = vpop.permute.xlu1 %464 }
 0x16a   : > { %v471_v12 = vsel %vm470_vm1, %v465_v8, %v467_v7 }
 0x16c   : > { %v469_v9 = vpop.permute.xlu0 %468 }
 0x16d   : > { %v479_v10 = vpop.permute.xlu1 %478  ;;  %629 = vmatpush1.bf16.msra.mxu1 %v469_v9  ;;  %v472_v11 = vsel %vm470_vm1, %v467_v7, %v469_v9 }
 0x16e   : > { %585 = vmatprep.subr.bf16.mxu0 %v472_v11  ;;  %630 = vmatprep.subr.bf16.mxu1 %v2001_v0 }
 0x16f   : > { %586 = vmatpush1.bf16.msra.mxu0 %v471_v12 }
 0x170   : > { %v481_v13 = vpop.permute.xlu0 %480 }
 0x171   : > { %v477_v14 = vpop.permute.xlu1 %476  ;;  %631 = vmatpush1.bf16.msra.mxu1 %v481_v13  ;;  %v484_v15 = vsel %vm482_vm2, %v479_v10, %v481_v13 }
 0x172   : > { %587 = vmatprep.subr.bf16.mxu0 %v484_v15  ;;  %v483_v16 = vsel %vm482_vm2, %v477_v14, %v479_v10  ;;  %632 = vmatprep.subr.bf16.mxu1 %v2001_v0 }
 0x173   : > { %588 = vmatpush1.bf16.msra.mxu0 %v483_v16 }
 0x174   : > { %v491_v17 = vpop.permute.xlu0 %490 }
 0x175   : > { %v493_v18 = vpop.permute.xlu1 %492 }
 0x176   : > { %v496_v19 = vsel %vm494_vm3, %v491_v17, %v493_v18  ;;  %633 = vmatpush1.bf16.msra.mxu1 %v493_v18 }
 0x177   : > { %589 = vmatprep.subr.bf16.mxu0 %v496_v19  ;;  %634 = vmatprep.subr.bf16.mxu1 %v2001_v0 }
 0x178   : > { %v489_v20 = vpop.permute.xlu0 %488 }
 0x179   : > { %v503_v21 = vpop.permute.xlu1 %502  ;;  %v495_v22 = vsel %vm494_vm3, %v489_v20, %v491_v17 }
 0x17a   : > { %590 = vmatpush1.bf16.msra.mxu0 %v495_v22 }
 0x17c   : > { %v505_v23 = vpop.permute.xlu0 %504 }
 0x17d   : > { %v501_v24 = vpop.permute.xlu1 %500  ;;  %635 = vmatpush1.bf16.msra.mxu1 %v505_v23  ;;  %v508_v25 = vsel %vm506_vm4, %v503_v21, %v505_v23 }
 0x17e   : > { %591 = vmatprep.subr.bf16.mxu0 %v508_v25  ;;  %v507_v26 = vsel %vm506_vm4, %v501_v24, %v503_v21  ;;  %636 = vmatprep.subr.bf16.mxu1 %v2001_v0 }
 0x17f   : > { %592 = vmatpush1.bf16.msra.mxu0 %v507_v26 }
 0x180   : > { %v515_v27 = vpop.permute.xlu0 %514 }
 0x181   : > { %v517_v28 = vpop.permute.xlu1 %516 }
 0x182   : > { %v520_v29 = vsel %vm518_vm5, %v515_v27, %v517_v28  ;;  %637 = vmatpush1.bf16.msra.mxu1 %v517_v28  ;;  %v426_v28 = vld [vmem:[#allocation10 + $0x8] sm:$0xff] }
 0x183   : > { %593 = vmatprep.subr.bf16.mxu0 %v520_v29  ;;  %638 = vmatprep.subr.bf16.mxu1 %v2001_v0  ;;  %v436_v29 = vld [vmem:[#allocation11 + $0x8] sm:$0xff] }
 0x184   : > { %v513_v30 = vpop.permute.xlu0 %512 }
 0x185   : > { %v527_v31 = vpop.permute.xlu1 %526  ;;  %v519_v32 = vsel %vm518_vm5, %v513_v30, %v515_v27  ;;  %v435_v30 = vld [vmem:[#allocation11] sm:$0xff] }
 0x186   : > { %594 = vmatpush1.bf16.msra.mxu0 %v519_v32  ;;  %v437_v32 = vld [vmem:[#allocation11 + $0x10] sm:$0xff] }
 0x188   : > { %v529_v33 = vpop.permute.xlu0 %528 }
 0x189   : > { %v525_v34 = vpop.permute.xlu1 %524  ;;  %639 = vmatpush1.bf16.msra.mxu1 %v529_v33  ;;  %v532_v35 = vsel %vm530_vm6, %v527_v31, %v529_v33 }
 0x18a   : > { %595 = vmatprep.subr.bf16.mxu0 %v532_v35  ;;  %v531_v36 = vsel %vm530_vm6, %v525_v34, %v527_v31  ;;  %640 = vmatprep.subr.bf16.mxu1 %v2001_v0  ;;  %v438_v31 = vld [vmem:[#allocation11 + $0x18] sm:$0xff] }
 0x18b   : > { %596 = vmatpush1.bf16.msra.mxu0 %v531_v36 }
 0x18c   : > { %v539_v37 = vpop.permute.xlu0 %538 }
 0x18d   : > { %v541_v38 = vpop.permute.xlu1 %540 }
 0x18e   : > { %v544_v39 = vsel %vm542_vm7, %v539_v37, %v541_v38  ;;  %641 = vmatpush1.bf16.msra.mxu1 %v541_v38 }
 0x18f   : > { %597 = vmatprep.subr.bf16.mxu0 %v544_v39  ;;  %642 = vmatprep.subr.bf16.mxu1 %v2001_v0 }
 0x190   : > { %v537_v40 = vpop.permute.xlu0 %536 }
 0x191   : > { %v551_v41 = vpop.permute.xlu1 %550  ;;  %v543_v42 = vsel %vm542_vm7, %v537_v40, %v539_v37 }
 0x192   : > { %598 = vmatpush1.bf16.msra.mxu0 %v543_v42 }
 0x194   : > { %v553_v43 = vpop.permute.xlu0 %552 }
 0x195   : > { %v549_v45 = vpop.permute.xlu1 %548  ;;  %643 = vmatpush1.bf16.msra.mxu1 %v553_v43  ;;  %v556_v46 = vsel %vm554_vm8, %v551_v41, %v553_v43 }
 0x196   : > { %599 = vmatprep.subr.bf16.mxu0 %v556_v46  ;;  %v555_v47 = vsel %vm554_vm8, %v549_v45, %v551_v41  ;;  %1385 = vmatprep.subr.bf16.mxu1 %v2010_v48 }
 0x197   : > { %600 = vmatpush1.bf16.msra.mxu0 %v555_v47 }
 0x198   : > { %659 = vmatmul.mubr.bf16.vlgmr.msra.gmra.mrb[0].mxu1 %v1674_v44 }
 0x199   : > { %1342 = vmatprep.mubr.msk.f32.mxu1 %vm579_vm0, %v426_v28 }
 0x19a   : > { %616 = vmatmul.mubr.bf16.vlgmr.msra.gmra.mrb[0].mxu0 %v1674_v44 }
 0x19b   : > { %1338 = vmatprep.mubr.msk.f32.mxu0 %vm579_vm0, %v426_v28 }
 0x1a5   : > { %v563_v52 = vpop.permute.xlu0 %562 }
 0x1a6   : > { %v568_v56 = vpop.permute.xlu1 %567 }
 0x26b   : > { %v660_v54 = vpop.f32.mrb[0].mxu1 }
 0x26c   : > { %v662_v58 = vpop.f32.mrb[1].mxu1  ;;  %v661_v59 = vadd.f32 %v660_v54, %v563_v52 }
 0x26d   : > { %v617_v61 = vpop.f32.mrb[0].mxu0  ;;  %v663_v62 = vpop.f32.mrb[2].mxu1 }
 0x26e   : > { %v669_v63 = vmax.f32 %v661_v59, 0.0  ;;  %v618_v0 = vadd.f32 %v617_v61, %v563_v52  ;;  %v664_v1 = vadd.f32 %v663_v62, %v568_v56  ;;  %v619_v2 = vpop.f32.mrb[1].mxu0  ;;  %v665_v3 = vpop.f32.mrb[3].mxu1 }
 0x26f   : > { %v620_v5 = vadd.f32 %v619_v2, %v563_v52  ;;  %v621_v7 = vpop.f32.mrb[2].mxu0 }
 0x270   : > { %v691_v8 = vmul.f32 %v2415_v60, %v669_v63  ;;  %v667_v9 = vmax.f32 %v618_v0, 0.0  ;;  %v672_v10 = vmax.f32 %v664_v1, 0.0  ;;  %v622_v11 = vadd.f32 %v621_v7, %v568_v56  ;;  %v623_v12 = vpop.f32.mrb[3].mxu0 }
 0x271   : > { %v668_v13 = vmax.f32 %v620_v5, 0.0  ;;  %v624_v14 = vadd.f32 %v623_v12, %v568_v56 }
 0x272   : > { %v694_v15 = vmul.f32 %v2415_v60, %v672_v10  ;;  %v670_v16 = vmax.f32 %v622_v11, 0.0  ;;  %v689_v19 = vmul.f32 %v677_v4, %v667_v9 }
 0x273   : > { %v690_v17 = vmul.f32 %v681_v6, %v668_v13  ;;  %v671_v18 = vmax.f32 %v624_v14, 0.0 }
 0x274   : > { %v692_v20 = vmul.f32 %v677_v4, %v670_v16  ;;  %v1386_v21 = vpack.c.bf16 %v694_v15, %v691_v8 }
 0x275   : > { %v693_v22 = vmul.f32 %v681_v6, %v671_v18  ;;  %v1555_v23 = vpack.i.bf16 %v691_v8, %v690_v17 }
 0x276   : > { %1387 = vmatpush1.bf16.msra.mxu1 %v1386_v21  ;;  %v1351_v24 = vpack.c.bf16 %v692_v20, %v689_v19  ;;  %v1575_v25 = vpack.i.bf16 %v692_v20, %v689_v19 }
 0x277   : > { %1556 = vrot.lane.b32.xlu0 %v1555_v23, %s2003_s9  ;;  %1551 = vrot.lane.b32.xlu1 %v1555_v23, %s2002_s12  ;;  %v1349_v26 = vpack.c.bf16 %v693_v22, %v690_v17  ;;  %v1585_v27 = vpack.i.bf16 %v694_v15, %v693_v22 }
 0x278   : > { %1388 = vmatprep.subr.bf16.mxu1 %v2010_v48 }
 0x279   : > { %1350 = vmatprep.subr.bf16.mxu0 %v1349_v26 }
 0x27a   : > { %1352 = vmatpush1.bf16.msra.mxu0 %v1351_v24 }
 0x27b   : > { %1566 = vrot.lane.b32.xlu0 %v1555_v23, %s2005_s14  ;;  %1561 = vrot.lane.b32.xlu1 %v1555_v23, %s2004_s16 }
 0x27f   : > { %1576 = vrot.lane.b32.xlu0 %v1575_v25, %s2003_s9  ;;  %1571 = vrot.lane.b32.xlu1 %v1575_v25, %s2002_s12 }
 0x283   : > { %1586 = vrot.lane.b32.xlu0 %v1585_v27, %s2002_s12  ;;  %1581 = vrot.lane.b32.xlu1 %v1575_v25, %s2004_s16  ;;  %s1167_s12 = scalar_lea.sflag [#allocation4], %s2337_s21 }
 0x287   : > { %1591 = vrot.lane.b32.xlu0 %v1575_v25, %s2005_s14  ;;  %1596 = vrot.lane.b32.xlu1 %v1555_v23, %s2006_s10 }
 0x28b   : > { %1611 = vrot.lane.b32.xlu0 %v1585_v27, %s2004_s16  ;;  %1601 = vrot.lane.b32.xlu1 %v1585_v27, %s2003_s9  ;;  %s1903_s9 = scalar_lea.vmem %s2524_s18, 16  ;;  %s1907_s16 = sshll.u32 %s2011_s11, 4  ;;  %s1908_s16 = int_to_ptr.vmem [resolvable:$false] %s1907_s16 }
 0x28c   : > { %p1904_p4 = scmp.ne.s32.totalorder %s2524_s18, %s1903_s9  ;;  %p1910_p2 = scmp.lt.s32.totalorder %s2524_s18, %s1908_s16 }
 0x28e   : > { %p1905_p13 = pnand %p1904_p4, %p2603_p1 }
 0x28f   : > { %1616 = vrot.lane.b32.xlu0 %v1555_v23, %s2007_s20  ;;  %1606 = vrot.lane.b32.xlu1 %v1575_v25, %s2006_s10 }
 0x290   : > { %p1906_p0 = pneg %p1905_p13 }
 0x293   : > { %1626 = vrot.lane.b32.xlu0 %v1585_v27, %s2006_s10  ;;  %1621 = vrot.lane.b32.xlu1 %v1585_v27, %s2005_s14 }
 0x297   : > { %1631 = vrot.lane.b32.xlu0 %v1575_v25, %s2007_s20  ;;  %1636 = vrot.lane.b32.xlu1 %v1555_v23, %s2008_s13 }
 0x29b   : > { %1651 = vrot.lane.b32.xlu0 %v1585_v27, %s2008_s13  ;;  %1641 = vrot.lane.b32.xlu1 %v1585_v27, %s2007_s20 }
 0x29f   : > { %1656 = vrot.lane.b32.xlu0 %v1555_v23, %s2009_s19  ;;  %1646 = vrot.lane.b32.xlu1 %v1575_v25, %s2008_s13 }
 0x2a3   : > { %1666 = vrot.lane.b32.xlu0 %v1575_v25, %s2009_s19  ;;  %1661 = vrot.lane.b32.xlu1 %v1585_v27, %s2009_s19 }
 0x2a7   : > { %892 = vperm.xlu0 %1548, %v436_v29   ;;  %887 = vperm.xlu1 %1549, %v435_v30  }
 0x2ab   : > { %902 = vperm.xlu0 %1548, %v438_v31   ;;  %897 = vperm.xlu1 %1549, %v437_v32  }
 0x2af   : > { %1103 = vrot.lane.b32.xlu1 %v677_v4, %s2005_s14  ;;  %1105 = vrot.lane.b32.xlu0 %v681_v6, %s2005_s14 }
 0x2b3   : > { %1107 = vrot.lane.b32.xlu1 %v2415_v60, %s2005_s14  ;;  %s1909_s14 = scalar_lea.vmem %s1908_s16, 32 }
 0x2b4   : > { %p1911_p8 = scmp.lt.s32.totalorder %s1909_s14, %s1903_s9 }
 0x2b6   : > { %p1912_p6 = por %p1911_p8, %p1910_p2 }
 0x2b8   : > { %p1913_p11 = pnand %p1912_p6, %p1906_p0 }
 0x2e9   : > { %v1557_v33 = vpop.permute.xlu0 %1556  ;;  %v1552_v34 = vpop.permute.xlu1 %1551 }
 0x2ea   : > { %v1554_v39 = vunpack.i.h.bf16 %v1552_v34  ;;  %v1553_v40 = vunpack.i.l.bf16 %v1552_v34  ;;  %v1559_v57 = vunpack.i.h.bf16 %v1557_v33  ;;  %v1558_v58 = vunpack.i.l.bf16 %v1557_v33 }
 0x2ec   : > { %v715_v47 = vsel %vm470_vm1, %v1553_v40, %v1554_v39  ;;  %v738_v12 = vsel %vm482_vm2, %v1558_v58, %v1559_v57 }
 0x2ed   : > { %v2450_v35 = vpop.permute.xlu0 %1566  ;;  %v2452_v36 = vpop.permute.xlu1 %1561 }
 0x2ee   : > { %v1564_v3 = vunpack.i.h.bf16 %v2452_v36  ;;  %v1563_v4 = vunpack.i.l.bf16 %v2452_v36  ;;  %v1569_v17 = vunpack.i.h.bf16 %v2450_v35  ;;  %v1568_v18 = vunpack.i.l.bf16 %v2450_v35 }
 0x2f0   : > { %v761_v20 = vsel %vm494_vm3, %v1563_v4, %v1564_v3 }
 0x2f1   : > { %v1577_v37 = vpop.permute.xlu0 %1576  ;;  %v1572_v38 = vpop.permute.xlu1 %1571 }
 0x2f2   : > { %v1573_v41 = vunpack.i.l.bf16 %v1572_v38  ;;  %v1574_v44 = vunpack.i.h.bf16 %v1572_v38  ;;  %v1579_v59 = vunpack.i.h.bf16 %v1577_v37  ;;  %v1578_v60 = vunpack.i.l.bf16 %v1577_v37 }
 0x2f4   : > { %v714_v49 = vsel %vm470_vm1, %v1573_v41, %v1553_v40  ;;  %v737_v7 = vsel %vm482_vm2, %v1578_v60, %v1558_v58 }
 0x2f5   : > { %v1587_v42 = vpop.permute.xlu0 %1586  ;;  %v1582_v43 = vpop.permute.xlu1 %1581 }
 0x2f6   : > { %v1589_v45 = vunpack.i.h.bf16 %v1587_v42  ;;  %v1588_v46 = vunpack.i.l.bf16 %v1587_v42  ;;  %v1584_v14 = vunpack.i.h.bf16 %v1582_v43  ;;  %v1583_v15 = vunpack.i.l.bf16 %v1582_v43 }
 0x2f8   : > { %v1389_v50 = vpack.c.bf16 %v1589_v45, %v1554_v39  ;;  %v716_v51 = vsel %vm470_vm1, %v1574_v44, %v1588_v46  ;;  %v717_v52 = vsel %vm470_vm1, %v1588_v46, %v1589_v45  ;;  %v760_v31 = vsel %vm494_vm3, %v1583_v15, %v1563_v4 }
 0x2f9   : > { %v1355_v53 = vpack.c.bf16 %v716_v51, %v714_v49  ;;  %v1592_v54 = vpop.permute.xlu0 %1591  ;;  %v2458_v55 = vpop.permute.xlu1 %1596  ;;  %v1353_v56 = vpack.c.bf16 %v717_v52, %v715_v47  ;;  %v784_v44 = vsel %vm506_vm4, %v1568_v18, %v1569_v17 }
 0x2fa   : > { %1390 = vmatpush1.bf16.msra.mxu1 %v1389_v50  ;;  %v1594_v21 = vunpack.i.h.bf16 %v1592_v54  ;;  %v1593_v22 = vunpack.i.l.bf16 %v1592_v54  ;;  %v1599_v32 = vunpack.i.h.bf16 %v2458_v55  ;;  %v1598_v33 = vunpack.i.l.bf16 %v2458_v55 }
 0x2fb   : > { %1354 = vmatprep.subr.bf16.mxu0 %v1353_v56  ;;  %1391 = vmatprep.subr.bf16.mxu1 %v2010_v48 }
 0x2fc   : > { %1356 = vmatpush1.bf16.msra.mxu0 %v1355_v53  ;;  %v783_v37 = vsel %vm506_vm4, %v1593_v22, %v1568_v18  ;;  %v807_v52 = vsel %vm518_vm5, %v1598_v33, %v1599_v32 }
 0x2fd   : > { %v1612_v61 = vpop.permute.xlu0 %1611  ;;  %v1602_v62 = vpop.permute.xlu1 %1601 }
 0x2fe   : > { %v1614_v63 = vunpack.i.h.bf16 %v1612_v61  ;;  %v1613_v0 = vunpack.i.l.bf16 %v1612_v61  ;;  %v1604_v1 = vunpack.i.h.bf16 %v1602_v62  ;;  %v1603_v2 = vunpack.i.l.bf16 %v1602_v62 }
 0x300   : > { %v1392_v5 = vpack.c.bf16 %v1604_v1, %v1559_v57  ;;  %v739_v6 = vsel %vm482_vm2, %v1579_v59, %v1603_v2  ;;  %v740_v10 = vsel %vm482_vm2, %v1603_v2, %v1604_v1  ;;  %v763_v13 = vsel %vm494_vm3, %v1613_v0, %v1614_v63 }
 0x301   : > { %v2465_v8 = vpop.permute.xlu0 %1616  ;;  %v1607_v9 = vpop.permute.xlu1 %1606  ;;  %v1359_v11 = vpack.c.bf16 %v739_v6, %v737_v7  ;;  %v1357_v16 = vpack.c.bf16 %v740_v10, %v738_v12  ;;  %v1395_v19 = vpack.c.bf16 %v1614_v63, %v1564_v3  ;;  %v762_v23 = vsel %vm494_vm3, %v1584_v14, %v1613_v0 }
 0x302   : > { %1393 = vmatpush1.bf16.msra.mxu1 %v1392_v5  ;;  %v1361_v26 = vpack.c.bf16 %v763_v13, %v761_v20  ;;  %v1363_v34 = vpack.c.bf16 %v762_v23, %v760_v31  ;;  %v1608_v38 = vunpack.i.l.bf16 %v1607_v9  ;;  %v1609_v42 = vunpack.i.h.bf16 %v1607_v9 }
 0x303   : > { %1394 = vmatprep.subr.bf16.mxu1 %v2010_v48  ;;  %1358 = vmatprep.subr.bf16.mxu0 %v1357_v16  ;;  %v1619_v46 = vunpack.i.h.bf16 %v2465_v8  ;;  %v1618_v47 = vunpack.i.l.bf16 %v2465_v8 }
 0x304   : > { %1360 = vmatpush1.bf16.msra.mxu0 %v1359_v11  ;;  %v806_v53 = vsel %vm518_vm5, %v1608_v38, %v1598_v33  ;;  %v429_v38 = vld [vmem:[#allocation10 + $0x20] sm:$0xff] }
 0x305   : > { %v1627_v24 = vpop.permute.xlu0 %1626  ;;  %v1622_v25 = vpop.permute.xlu1 %1621  ;;  %1362 = vmatprep.subr.bf16.mxu0 %v1361_v26  ;;  %v830_v1 = vsel %vm530_vm6, %v1618_v47, %v1619_v46 }
 0x306   : > { %v1629_v27 = vunpack.i.h.bf16 %v1627_v24  ;;  %v1628_v28 = vunpack.i.l.bf16 %v1627_v24  ;;  %v1624_v29 = vunpack.i.h.bf16 %v1622_v25  ;;  %v1623_v30 = vunpack.i.l.bf16 %v1622_v25  ;;  %1396 = vmatpush1.bf16.msra.mxu1 %v1395_v19 }
 0x307   : > { %1397 = vmatprep.subr.bf16.mxu1 %v2010_v48 }
 0x308   : > { %v1398_v35 = vpack.c.bf16 %v1624_v29, %v1569_v17  ;;  %v785_v36 = vsel %vm506_vm4, %v1594_v21, %v1623_v30  ;;  %v786_v41 = vsel %vm506_vm4, %v1623_v30, %v1624_v29  ;;  %1364 = vmatpush1.bf16.msra.mxu0 %v1363_v34  ;;  %v809_v45 = vsel %vm518_vm5, %v1628_v28, %v1629_v27 }
 0x309   : > { %v1632_v39 = vpop.permute.xlu0 %1631  ;;  %v1637_v40 = vpop.permute.xlu1 %1636  ;;  %v1367_v43 = vpack.c.bf16 %v785_v36, %v783_v37  ;;  %v1365_v49 = vpack.c.bf16 %v786_v41, %v784_v44  ;;  %v808_v50 = vsel %vm518_vm5, %v1609_v42, %v1628_v28  ;;  %v1401_v51 = vpack.c.bf16 %v1629_v27, %v1599_v32  ;;  %v428_v36 = vld [vmem:[#allocation10 + $0x18] sm:$0xff]  ;;  %v430_v37 = vld [vmem:[#allocation10 + $0x28] sm:$0xff] }
 0x30a   : > { %1399 = vmatpush1.bf16.msra.mxu1 %v1398_v35  ;;  %v1634_v54 = vunpack.i.h.bf16 %v1632_v39  ;;  %v1633_v55 = vunpack.i.l.bf16 %v1632_v39  ;;  %v1369_v58 = vpack.c.bf16 %v809_v45, %v807_v52  ;;  %v1371_v63 = vpack.c.bf16 %v808_v50, %v806_v53  ;;  %v425_v35 = vld [vmem:[#allocation10] sm:$0xff]  ;;  %v432_v39 = vld [vmem:[#allocation10 + $0x38] sm:$0xff] }
 0x30b   : > { %1400 = vmatprep.subr.bf16.mxu1 %v2010_v48  ;;  %1366 = vmatprep.subr.bf16.mxu0 %v1365_v49  ;;  %v1639_v0 = vunpack.i.h.bf16 %v1637_v40  ;;  %v1638_v2 = vunpack.i.l.bf16 %v1637_v40  ;;  %v431_v40 = vld [vmem:[#allocation10 + $0x30] sm:$0xff] }
 0x30c   : > { %1368 = vmatpush1.bf16.msra.mxu0 %v1367_v43  ;;  %v829_v6 = vsel %vm530_vm6, %v1633_v55, %v1618_v47 }
 0x30d   : > { %v1652_v56 = vpop.permute.xlu0 %1651  ;;  %v1642_v57 = vpop.permute.xlu1 %1641  ;;  %1370 = vmatprep.subr.bf16.mxu0 %v1369_v58  ;;  %v853_v19 = vsel %vm542_vm7, %v1638_v2, %v1639_v0 }
 0x30e   : > { %v1654_v59 = vunpack.i.h.bf16 %v1652_v56  ;;  %v1653_v60 = vunpack.i.l.bf16 %v1652_v56  ;;  %v1644_v61 = vunpack.i.h.bf16 %v1642_v57  ;;  %v1643_v62 = vunpack.i.l.bf16 %v1642_v57  ;;  %1402 = vmatpush1.bf16.msra.mxu1 %v1401_v51 }
 0x30f   : > { %1403 = vmatprep.subr.bf16.mxu1 %v2010_v48 }
 0x310   : > { %v1404_v3 = vpack.c.bf16 %v1644_v61, %v1619_v46  ;;  %v831_v4 = vsel %vm530_vm6, %v1634_v54, %v1643_v62  ;;  %v832_v5 = vsel %vm530_vm6, %v1643_v62, %v1644_v61  ;;  %1372 = vmatpush1.bf16.msra.mxu0 %v1371_v63  ;;  %v855_v13 = vsel %vm542_vm7, %v1653_v60, %v1654_v59 }
 0x311   : > { %v1657_v7 = vpop.permute.xlu0 %1656  ;;  %v1647_v8 = vpop.permute.xlu1 %1646  ;;  %v1373_v9 = vpack.c.bf16 %v832_v5, %v830_v1  ;;  %v1375_v10 = vpack.c.bf16 %v831_v4, %v829_v6  ;;  %v1407_v16 = vpack.c.bf16 %v1654_v59, %v1639_v0  ;;  %v1377_v23 = vpack.c.bf16 %v855_v13, %v853_v19 }
 0x312   : > { %v1649_v11 = vunpack.i.h.bf16 %v1647_v8  ;;  %v1648_v12 = vunpack.i.l.bf16 %v1647_v8  ;;  %1405 = vmatpush1.bf16.msra.mxu1 %v1404_v3  ;;  %v1659_v14 = vunpack.i.h.bf16 %v1657_v7  ;;  %v1658_v15 = vunpack.i.l.bf16 %v1657_v7 }
 0x313   : > { %1374 = vmatprep.subr.bf16.mxu0 %v1373_v9  ;;  %1406 = vmatprep.subr.bf16.mxu1 %v2010_v48 }
 0x314   : > { %v854_v17 = vsel %vm542_vm7, %v1649_v11, %v1653_v60  ;;  %v852_v18 = vsel %vm542_vm7, %v1648_v12, %v1638_v2  ;;  %1376 = vmatpush1.bf16.msra.mxu0 %v1375_v10  ;;  %v876_v28 = vsel %vm554_vm8, %v1658_v15, %v1659_v14 }
 0x315   : > { %v1379_v20 = vpack.c.bf16 %v854_v17, %v852_v18  ;;  %v1667_v21 = vpop.permute.xlu0 %1666  ;;  %v1662_v22 = vpop.permute.xlu1 %1661  ;;  %1378 = vmatprep.subr.bf16.mxu0 %v1377_v23 }
 0x316   : > { %v1669_v24 = vunpack.i.h.bf16 %v1667_v21  ;;  %v1668_v25 = vunpack.i.l.bf16 %v1667_v21  ;;  %v1664_v26 = vunpack.i.h.bf16 %v1662_v22  ;;  %v1663_v27 = vunpack.i.l.bf16 %v1662_v22  ;;  %1408 = vmatpush1.bf16.msra.mxu1 %v1407_v16 }
 0x317   : > { %1409 = vmatprep.subr.bf16.mxu1 %v2010_v48  ;;  %v427_v48 = vld [vmem:[#allocation10 + $0x10] sm:$0xff] }
 0x318   : > { %v875_v29 = vsel %vm554_vm8, %v1668_v25, %v1658_v15  ;;  %v1410_v30 = vpack.c.bf16 %v1664_v26, %v1659_v14  ;;  %v877_v31 = vsel %vm554_vm8, %v1669_v24, %v1663_v27  ;;  %v878_v32 = vsel %vm554_vm8, %v1663_v27, %v1664_v26  ;;  %1380 = vmatpush1.bf16.msra.mxu0 %v1379_v20 }
 0x319   : > { %v1381_v33 = vpack.c.bf16 %v878_v32, %v876_v28  ;;  %v1383_v34 = vpack.c.bf16 %v877_v31, %v875_v29 }
 0x31a   : > { %1411 = vmatpush1.bf16.msra.mxu1 %v1410_v30 }
 0x31b   : > { %1382 = vmatprep.subr.bf16.mxu0 %v1381_v33 }
 0x31c   : > { %1384 = vmatpush1.bf16.msra.mxu0 %v1383_v34 }
 0x31d   : > { %1071 = vmatmul.mubr.f32.vlgmr.msra.gmra.mrb[4].mxu1 %v425_v35 }
 0x31e   : > { %1343 = vmatprep.mubr.msk.f32.mxu1 %vm579_vm0, %v428_v36 }
 0x31f   : > { %982 = vmatmul.mubr.f32.vlgmr.msra.gmra.mrb[4].mxu0 %v425_v35 }
 0x320   : > { %1339 = vmatprep.mubr.msk.f32.mxu0 %vm579_vm0, %v428_v36 }
 0x321   : > { %1076 = vmatmul.mubr.f32.gmra.mrb[6].mxu1 %v427_v48 }
 0x322   : > { %1344 = vmatprep.mubr.msk.f32.mxu1 %vm579_vm0, %v430_v37 }
 0x323   : > { %988 = vmatmul.mubr.f32.gmra.mrb[6].mxu0 %v427_v48 }
 0x324   : > { %1340 = vmatprep.mubr.msk.f32.mxu0 %vm579_vm0, %v430_v37 }
 0x325   : > { %1081 = vmatmul.mubr.f32.gmra.mrb[8].mxu1 %v429_v38 }
 0x326   : > { %1345 = vmatprep.mubr.msk.f32.mxu1 %vm579_vm0, %v432_v39  ;;  %v888_v41 = vpop.permute.xlu1 %887  ;;  %v893_v42 = vpop.permute.xlu0 %892 }
 0x327   : > { %994 = vmatmul.mubr.f32.gmra.mrb[8].mxu0 %v429_v38 }
 0x328   : > { %1341 = vmatprep.mubr.msk.f32.mxu0 %vm579_vm0, %v432_v39 }
 0x329   : > { %1086 = vmatmul.mubr.f32.gmra.mrb[10].mxu1 %v431_v40 }
 0x32a   : > { %v898_v43 = vpop.permute.xlu1 %897  ;;  %v903_v45 = vpop.permute.xlu0 %902 }
 0x32b   : > { %1000 = vmatmul.mubr.f32.gmra.mrb[10].mxu0 %v431_v40 }
 0x32e   : > { %v1104_v44 = vpop.permute.xlu1 %1103  ;;  %v1106_v51 = vpop.permute.xlu0 %1105 }
 0x32f   : > { %v1109_v60 = vsel %vm506_vm4, %v1104_v44, %v1106_v51 }
 0x332   : > { %v1108_v50 = vpop.permute.xlu1 %1107 }
 0x333   : > { %v1110_v62 = vsel %vm506_vm4, %v1106_v51, %v1108_v50 }
 0x3f0   : > { %v1072_v46 = vpop.f32.mrb[4].mxu1 }
 0x3f1   : > { %v1073_v47 = vadd.f32 %v1072_v46, %v888_v41  ;;  %v1074_v49 = vpop.f32.mrb[5].mxu1 }
 0x3f2   : > { %v983_v53 = vpop.f32.mrb[4].mxu0 }
 0x3f3   : > { %v1093_v52 = vmax.f32 %v1073_v47, 0.0  ;;  %v984_v55 = vadd.f32 %v983_v53, %v888_v41  ;;  %v985_v56 = vpop.f32.mrb[5].mxu0 }
 0x3f4   : > { %v1077_v54 = vpop.f32.mrb[6].mxu1  ;;  %v986_v59 = vadd.f32 %v985_v56, %v888_v41 }
 0x3f5   : > { %v1078_v57 = vadd.f32 %v1077_v54, %v893_v42  ;;  %v1079_v58 = vpop.f32.mrb[7].mxu1  ;;  %v1091_v61 = vmax.f32 %v984_v55, 0.0  ;;  %v1116_v3 = vmul.f32 %v1108_v50, %v1093_v52  ;;  %v440_v55 = vld [vmem:[#allocation13 + $0x8] sm:$0xff] }
 0x3f6   : > { %v1092_v63 = vmax.f32 %v986_v59, 0.0  ;;  %v989_v1 = vpop.f32.mrb[6].mxu0  ;;  %v441_v58 = vld [vmem:[#allocation13 + $0x10] sm:$0xff] }
 0x3f7   : > { %v1096_v0 = vmax.f32 %v1078_v57, 0.0  ;;  %v990_v4 = vadd.f32 %v989_v1, %v893_v42  ;;  %v991_v5 = vpop.f32.mrb[7].mxu0  ;;  %v1114_v8 = vmul.f32 %v1109_v60, %v1091_v61  ;;  %v1128_v17 = vsel %vm1127_vm9, %v1116_v3, 0.0  ;;  %v439_v57 = vld [vmem:[#allocation13] sm:$0xff] }
 0x3f8   : > { %v1082_v2 = vpop.f32.mrb[8].mxu1  ;;  %v992_v9 = vadd.f32 %v991_v5, %v893_v42  ;;  %v1115_v10 = vmul.f32 %v1110_v62, %v1092_v63  ;;  %v442_v63 = vld [vmem:[#allocation13 + $0x18] sm:$0xff] }
 0x3f9   : > { %v1083_v6 = vadd.f32 %v1082_v2, %v898_v43  ;;  %v1084_v7 = vpop.f32.mrb[9].mxu1  ;;  %v1094_v11 = vmax.f32 %v990_v4, 0.0  ;;  %v1119_v12 = vmul.f32 %v1108_v50, %v1096_v0 }
 0x3fa   : > { %v1095_v13 = vmax.f32 %v992_v9, 0.0  ;;  %v995_v14 = vpop.f32.mrb[8].mxu0  ;;  %v1126_v16 = vadd.f32 %v1115_v10, %v1114_v8 }
 0x3fb   : > { %v1117_v18 = vmul.f32 %v1109_v60, %v1094_v11  ;;  %v1099_v19 = vmax.f32 %v1083_v6, 0.0  ;;  %v996_v20 = vadd.f32 %v995_v14, %v898_v43  ;;  %v997_v21 = vpop.f32.mrb[9].mxu0  ;;  %v1133_v31 = vsel %vm1127_vm9, %v1119_v12, 0.0  ;;  %v443_v11 = vld [vmem:[#allocation14] sm:$0x1] }
 0x3fc   : > { %v1087_v15 = vpop.f32.mrb[10].mxu1  ;;  %v1118_v24 = vmul.f32 %v1110_v62, %v1095_v13  ;;  %v998_v25 = vadd.f32 %v997_v21, %v898_v43  ;;  %v1129_v26 = vadd.f32 %v1128_v17, %v1126_v16 }
 0x3fd   : > { %v1088_v22 = vadd.f32 %v1087_v15, %v903_v45  ;;  %v1089_v23 = vpop.f32.mrb[11].mxu1  ;;  %v1097_v27 = vmax.f32 %v996_v20, 0.0  ;;  %v1122_v32 = vmul.f32 %v1108_v50, %v1099_v19 }
 0x3fe   : > { %v1098_v28 = vmax.f32 %v998_v25, 0.0  ;;  %v1001_v29 = vpop.f32.mrb[10].mxu0  ;;  %1130 = vadd.xlane.f32.xlu0 %v1129_v26  ;;  %v1132_v30 = vadd.f32 %v1118_v24, %v1117_v18 }
 0x3ff   : > { %v1120_v33 = vmul.f32 %v1109_v60, %v1097_v27  ;;  %v1102_v34 = vmax.f32 %v1088_v22, 0.0  ;;  %v1002_v35 = vadd.f32 %v1001_v29, %v903_v45  ;;  %v1003_v36 = vpop.f32.mrb[11].mxu0  ;;  %v1138_v44 = vsel %vm1127_vm9, %v1122_v32, 0.0 }
 0x400   : > { %v1121_v48 = vmul.f32 %v1110_v62, %v1098_v28  ;;  %v1004_v37 = vadd.f32 %v1003_v36, %v903_v45  ;;  %v1134_v38 = vadd.f32 %v1133_v31, %v1132_v30 }
 0x401   : > { %v1100_v39 = vmax.f32 %v1002_v35, 0.0  ;;  %v1125_v42 = vmul.f32 %v1108_v50, %v1102_v34 }
 0x402   : > { %v1101_v40 = vmax.f32 %v1004_v37, 0.0  ;;  %1135 = vadd.xlane.f32.xlu1 %v1134_v38  ;;  %v1137_v41 = vadd.f32 %v1121_v48, %v1120_v33 }
 0x403   : > { %v1123_v43 = vmul.f32 %v1109_v60, %v1100_v39  ;;  %v1143_v51 = vsel %vm1127_vm9, %v1125_v42, 0.0 }
 0x404   : > { %v1124_v46 = vmul.f32 %v1110_v62, %v1101_v40  ;;  %v1139_v47 = vadd.f32 %v1138_v44, %v1137_v41 }
 0x406   : > { %1140 = vadd.xlane.f32.xlu0 %v1139_v47  ;;  %v1142_v49 = vadd.f32 %v1124_v46, %v1123_v43 }
 0x408   : > { %v1144_v52 = vadd.f32 %v1143_v51, %v1142_v49 }
 0x40a   : > { %1145 = vadd.xlane.f32.xlu0 %v1144_v52 }
 0x48b   : > { %v1131_v53 = vpop.xlane.xlu0 %1130 }
 0x48c   : > { %v1147_v56 = vmul.f32 0.00390625, %v1131_v53 }
 0x48e   : > { %v1151_v61 = vmul.f32 %v1147_v56, %v439_v57 }
 0x48f   : > { %v1136_v54 = vpop.xlane.xlu1 %1135 }
 0x490   : > { %v1148_v45 = vmul.f32 0.00390625, %v1136_v54 }
 0x492   : > { %v1152_v50 = vmul.f32 %v1148_v45, %v440_v55 }
 0x493   : > { %v1141_v59 = vpop.xlane.xlu0 %1140 }
 0x494   : > { %v1149_v60 = vmul.f32 0.00390625, %v1141_v59  ;;  %v1155_v1 = vadd.f32 %v1152_v50, %v1151_v61 }
 0x496   : > { %v1153_v62 = vmul.f32 %v1149_v60, %v441_v58 }
 0x497   : > { %v1146_v0 = vpop.xlane.xlu0 %1145 }
 0x498   : > { %v1150_v2 = vmul.f32 0.00390625, %v1146_v0  ;;  %v1156_v3 = vadd.f32 %v1155_v1, %v1153_v62 }
 0x49a   : > { %v1154_v4 = vmul.f32 %v1150_v2, %v442_v63 }
 0x49c   : > { %v1157_v5 = vadd.f32 %v1156_v3, %v1154_v4 }
 0x49e   : > { %v1158_v6 = vrot.slane %v1157_v5, 4 }
 0x4a0   : > { %v1159_v7 = vadd.f32 %v1158_v6, %v1157_v5 }
 0x4a2   : > { %v1160_v8 = vrot.slane %v1159_v7, 2 }
 0x4a4   : > { %v1161_v9 = vadd.f32 %v1160_v8, %v1159_v7 }
 0x4a6   : > { %v1162_v10 = vrot.slane %v1161_v9, 1 }
 0x4a8   : > { %v1163_v12 = vadd.f32 %v1162_v10, %v1161_v9 }
 0x4aa   : > { %v1164_v13 = vadd.f32 %v1163_v12, %v443_v11 }
 0x4ac   : > { %1165 = vst [vmem:[%s420_s23] sm:$0x1] %v1164_v13 }
 0x4ad   : > { %1916 = shalt.err (!%p1913_p11)
}
 0x4ae   : > { %s1917_s21 = scalar_lea.hbm %s2522_s17, 16  ;;  %s1921_s13 = scalar_lea.hbm %s2574_s8, 32 }
 0x4af   : > { %p1918_p12 = scmp.ne.s32.totalorder %s2522_s17, %s1917_s21  ;;  %p1922_p9 = scmp.lt.u32.totalorder %s2522_s17, %s2574_s8 }
 0x4b0   : > { %p1923_p7 = scmp.lt.u32.totalorder %s1921_s13, %s1917_s21  ;;  %p1925_p4 = scmp.lt.u32.totalorder %s1917_s21, %s2522_s17 }
 0x4b1   : > { %p1919_p3 = pnand %p1918_p12, %p2603_p1 }
 0x4b2   : > { %p1924_p10 = por %p1923_p7, %p1922_p9 }
 0x4b3   : > { %p1920_p5 = pneg %p1919_p3 }
 0x4b4   : > { %p1926_p13 = por %p1925_p4, %p1924_p10 }
 0x4b6   : > { %p1927_p0 = pnand %p1926_p13, %p1920_p5 }
 0x4b8   : > { %1930 = shalt.err (!%p1927_p0)
}
 0x4b9   : > { %1445 = dma.vmem_to_hbm [thread:$0]  (%p2603_p1), %s2524_s18, 16, %s2522_s17, %s1167_s12  }
 0x4ba PF: > { %s1191_s23 = sand.u32 1, %s1973_s27   ;;  %p2604_p2 = scmp.ne.s32.totalorder %s2592_s1, 0 }
 0x4bb   : > { %p2605_p8 = scmp.ge.s32.totalorder %s1985_s30, 2  ;;  %s1192_s24 = scalar_lea.sflag [#allocation4], %s1191_s23 }
 0x4bd   : > { %p1474_p6 = pnand %p2605_p8, %p2604_p2 }
 0x4bf   : > { %1968 = dma.done.wait (!%p1474_p6), %s1192_s24, 16  }
 0x4c0   : > { %1970 = vsyncadd (!%p1474_p6), %s1192_s24, 4294967280  ;;  %p25_p11 = scmp.ge.s32.totalorder %s2264_s15, 4   ;;  %s2606_s27 = smov %s1977_s28 }
 0x4c1   : > { %s2607_s28 = smov %s1981_s29  ;;  %s2608_s29 = smov %s2276_s2 }
 0x4c2   : > { %s2609_s30 = smov %s2264_s15  ;;  %27 = sbr.rel (!%p25_p11) target bundleno = 12 (0xc), region = 125 }
 0x4c9   :  { %1196 = vsyncpa [#allocation3], 1 }
 0x4ca   :  { %1198 = vsyncpa [#allocation3 + $0x1], 1 }
 0x4cb   :  { %1199 = vsyncpa [#allocation6], 1 }
 0x4cc   :  { %1200 = vsyncpa [#allocation9], 1 }
 0x4cd   :  { %1201 = vsyncpa [#allocation12], 1 }
 0x4ce   :  { %1202 = vsyncpa [#allocation15], 1 }
 0x4cf   :  { %1203 = vsyncpa [#allocation4], 1 }
 0x4d0   :  { %1205 = vsyncpa [#allocation4 + $0x1], 1 }

</bundles_post_ra>
